<compile_context>
chip_gen: v7x
topology: tpu7x:2x2x1
jax: 0.10.0
libtpu: 0.0.40
codegen_flags: <defaults>
</compile_context>

<pallas_src>
import functools
import math

import jax
import jax.numpy as jnp
from jax.experimental import pallas as pl
from jax.experimental.pallas import tpu as pltpu


def _round_up(x, m):
    return (x + m - 1) // m * m


def _windowed_pe_kernel(w_ref, x_ref, o_ref, *, freqs, in_channels, include_identity):
    """One grid step: encode a lane-dense tile of points.

    w_ref : SMEM (n_freqs,) f32        per-frequency window weights
    x_ref : VMEM (C, tile_n)           points along lanes, channels on sublanes
    o_ref : VMEM (out_channels, tile_n)
    """
    c = in_channels
    x = x_ref[...].astype(jnp.float32)                  # (C, tile_n), lane-dense

    base = 0
    if include_identity:
        o_ref[0:c, :] = x.astype(o_ref.dtype)           # identity block
        base = c

    # n_freqs is small and static: unrolled Python loop.  Frequencies are
    # compile-time constants, so no operand is transposed / relayouted per step.
    for j, f in enumerate(freqs):
        w = w_ref[j]                                    # scalar read from SMEM
        arg = x * f                                     # (C, tile_n)
        r0 = base + 2 * j * c
        # Write sin / cos halves straight into the output ref (no concat).
        o_ref[r0:r0 + c, :] = (w * jnp.sin(arg)).astype(o_ref.dtype)
        o_ref[r0 + c:r0 + 2 * c, :] = (w * jnp.cos(arg)).astype(o_ref.dtype)


@functools.partial(jax.jit, static_argnames=("freqs", "tile_n", "include_identity"))
def windowed_pe(x, weights, *, freqs, tile_n=2048, include_identity=True):
    """Windowed positional encoding (Pallas TPU).

    x        : (..., in_channels) array.
    weights  : (n_freqs,) f32 window weights (the PyTorch weight(j) schedule).
    freqs    : static tuple of python floats, freq_multiplier ** (1..n_freqs).

    Returns (..., out_channels), out_channels = C * (2*n_freqs + 1) (identity
    included) in exactly the PyTorch ordering:
      [x, w0*sin(f0*x), w0*cos(f0*x), w1*sin(f1*x), w1*cos(f1*x), ...]
    """
    *lead, c = x.shape
    n = math.prod(lead) if lead else 1
    n_freqs = len(freqs)
    out_c = c * (2 * n_freqs + (1 if include_identity else 0))

    # Lane-dense layout: points along lanes.  Largest tile <= tile_n covering N,
    # always a multiple of 128 lanes; ragged N is zero-padded and sliced back.
    tile = max(128, min(_round_up(tile_n, 128), _round_up(n, 128)))
    n_pad = _round_up(n, tile)

    x2 = x.reshape(n, c)
    x_t = jnp.pad(x2, ((0, n_pad - n), (0, 0))).T        # (C, n_pad) - layout plumbing
    weights = weights.astype(jnp.float32)

    kernel = functools.partial(
        _windowed_pe_kernel,
        freqs=freqs,
        in_channels=c,
        include_identity=include_identity,
    )

    out_t = pl.pallas_call(
        kernel,
        out_shape=jax.ShapeDtypeStruct((out_c, n_pad), x.dtype),
        grid_spec=pltpu.PrefetchScalarGridSpec(
            num_scalar_prefetch=0,
            grid=(n_pad // tile,),
            in_specs=[
                # Tiny constant weight table: whole array in SMEM, not pipelined.
                pl.BlockSpec(memory_space=pltpu.MemorySpace.SMEM),
                pl.BlockSpec((c, tile), lambda i: (0, i)),
            ],
            out_specs=pl.BlockSpec((out_c, tile), lambda i: (0, i)),
        ),
        compiler_params=pltpu.CompilerParams(
            dimension_semantics=("parallel",),
        ),
    )(weights, x_t)

    # Back to the PyTorch contract (..., out_channels).
    out = out_t[:, :n].T
    return out.reshape(*lead, out_c)


def windowed_weights(n_freqs, cur_iter, wait_iters, max_freq_iter):
    """Host-side replica of WindowedPE.weight(j) for j in [0, n_freqs)."""
    ws = []
    for j in range(n_freqs):
        if max_freq_iter == 0:
            w = 1.0
        elif cur_iter < wait_iters:
            w = 0.0
        elif cur_iter > max_freq_iter:
            w = 1.0
        else:
            ci = cur_iter - wait_iters
            alpha = ci / max_freq_iter * n_freqs
            w = (1.0 - math.cos(math.pi * min(max(alpha - j, 0.0), 1.0))) / 2.0
        ws.append(w)
    return jnp.asarray(ws, dtype=jnp.float32)


def windowed_pe_ref(x, weights, freqs, include_identity=True):
    outs = [x] if include_identity else []
    for j, f in enumerate(freqs):
        outs.append(weights[j] * jnp.sin(f * x))
        outs.append(weights[j] * jnp.cos(f * x))
    return jnp.concatenate(outs, axis=-1)


if __name__ == "__main__":
    # Config mirroring cfg.{n_freqs, wait_iters, max_freq_iter, freq_multiplier}
    in_channels = 4
    n_freqs = 6
    freq_multiplier = 2.0
    wait_iters = 0
    max_freq_iter = 100.0
    cur_iter = 37  # mid-anneal -> nontrivial per-frequency window weights
    # TODO(synk): training-schedule state (set_iter) lives host-side; the kernel just
    # consumes the resulting (n_freqs,) weight table.

    freqs = tuple(float(freq_multiplier) ** k for k in range(1, n_freqs + 1))
    weights = windowed_weights(n_freqs, cur_iter, wait_iters, max_freq_iter)
    out_c = in_channels * (2 * n_freqs + 1)

    key = jax.random.PRNGKey(0)
    x = jax.random.normal(key, (2, 16, 16, in_channels), dtype=jnp.float32)

    out = jax.block_until_ready(windowed_pe(x, weights, freqs=freqs))
    assert out.shape == (2, 16, 16, out_c), out.shape
    ref = windowed_pe_ref(x, weights, freqs)
    assert jnp.allclose(out, ref, atol=1e-4, rtol=1e-4), float(
        jnp.max(jnp.abs(out - ref))
    )

    # Ragged point count (not a multiple of 128) exercises the padded-tail path.
    x2 = jax.random.normal(jax.random.PRNGKey(0), (7, 9, in_channels), dtype=jnp.float32)
    out2 = jax.block_until_ready(windowed_pe(x2, weights, freqs=freqs))
    ref2 = windowed_pe_ref(x2, weights, freqs)
    assert out2.shape == (7, 9, out_c), out2.shape
    assert jnp.allclose(out2, ref2, atol=1e-4, rtol=1e-4)

    print("KERNEL_OK")
</pallas_src>

<mosaic_0001>
module attributes {stable_mosaic.version = 11 : i64} {
  func.func @_windowed_pe_kernel(%arg0: i32, %arg1: memref<6xf32, #tpu.memory_space<smem>>, %arg2: memref<4x512xf32, #tpu.memory_space<vmem>>, %arg3: memref<52x512xf32, #tpu.memory_space<vmem>>) attributes {dimension_semantics = [#tpu.dimension_semantics<parallel>], iteration_bounds = array<i64: 1>, scalar_prefetch = 0 : i64, scratch_operands = 0 : i64, tpu.core_type = #tpu.core_type<tc>, window_params = [{transform_indices = @transform_0, window_bounds = array<i64: 6>}, {transform_indices = @transform_1, window_bounds = array<i64: 4, 512>}, {transform_indices = @transform_2, window_bounds = array<i64: 52, 512>}]} {
    %c0 = arith.constant 0 : index
    %c0_0 = arith.constant 0 : index
    %0 = vector.load %arg2[%c0, %c0_0] : memref<4x512xf32, #tpu.memory_space<vmem>>, vector<4x512xf32>
    %c0_1 = arith.constant 0 : index
    %c0_2 = arith.constant 0 : index
    %1 = vector.load %arg3[%c0_1, %c0_2] : memref<52x512xf32, #tpu.memory_space<vmem>>, vector<4x512xf32>
    tpu.vector_store %arg3[%c0_1, %c0_2], %0 {strides = array<i32>} : memref<52x512xf32, #tpu.memory_space<vmem>>, vector<4x512xf32>,
    %c0_3 = arith.constant 0 : index
    %2 = memref.load %arg1[%c0_3] : memref<6xf32, #tpu.memory_space<smem>>
    %cst = arith.constant 2.000000e+00 : f32
    %3 = vector.broadcast %cst : f32 to vector<4x512xf32>
    %4 = arith.mulf %0, %3 : vector<4x512xf32>
    %5 = math.sin %4 : vector<4x512xf32>
    %6 = vector.broadcast %2 : f32 to vector<4x512xf32>
    %7 = arith.mulf %6, %5 : vector<4x512xf32>
    %c4 = arith.constant 4 : index
    %c0_4 = arith.constant 0 : index
    %8 = vector.load %arg3[%c4, %c0_4] : memref<52x512xf32, #tpu.memory_space<vmem>>, vector<4x512xf32>
    tpu.vector_store %arg3[%c4, %c0_4], %7 {strides = array<i32>} : memref<52x512xf32, #tpu.memory_space<vmem>>, vector<4x512xf32>,
    %9 = math.cos %4 : vector<4x512xf32>
    %10 = vector.broadcast %2 : f32 to vector<4x512xf32>
    %11 = arith.mulf %10, %9 : vector<4x512xf32>
    %c8 = arith.constant 8 : index
    %c0_5 = arith.constant 0 : index
    %12 = vector.load %arg3[%c8, %c0_5] : memref<52x512xf32, #tpu.memory_space<vmem>>, vector<4x512xf32>
    tpu.vector_store %arg3[%c8, %c0_5], %11 {strides = array<i32>} : memref<52x512xf32, #tpu.memory_space<vmem>>, vector<4x512xf32>,
    %c1 = arith.constant 1 : index
    %13 = memref.load %arg1[%c1] : memref<6xf32, #tpu.memory_space<smem>>
    %cst_6 = arith.constant 4.000000e+00 : f32
    %14 = vector.broadcast %cst_6 : f32 to vector<4x512xf32>
    %15 = arith.mulf %0, %14 : vector<4x512xf32>
    %16 = math.sin %15 : vector<4x512xf32>
    %17 = vector.broadcast %13 : f32 to vector<4x512xf32>
    %18 = arith.mulf %17, %16 : vector<4x512xf32>
    %c12 = arith.constant 12 : index
    %c0_7 = arith.constant 0 : index
    %19 = vector.load %arg3[%c12, %c0_7] : memref<52x512xf32, #tpu.memory_space<vmem>>, vector<4x512xf32>
    tpu.vector_store %arg3[%c12, %c0_7], %18 {strides = array<i32>} : memref<52x512xf32, #tpu.memory_space<vmem>>, vector<4x512xf32>,
    %20 = math.cos %15 : vector<4x512xf32>
    %21 = vector.broadcast %13 : f32 to vector<4x512xf32>
    %22 = arith.mulf %21, %20 : vector<4x512xf32>
    %c16 = arith.constant 16 : index
    %c0_8 = arith.constant 0 : index
    %23 = vector.load %arg3[%c16, %c0_8] : memref<52x512xf32, #tpu.memory_space<vmem>>, vector<4x512xf32>
    tpu.vector_store %arg3[%c16, %c0_8], %22 {strides = array<i32>} : memref<52x512xf32, #tpu.memory_space<vmem>>, vector<4x512xf32>,
    %c2 = arith.constant 2 : index
    %24 = memref.load %arg1[%c2] : memref<6xf32, #tpu.memory_space<smem>>
    %cst_9 = arith.constant 8.000000e+00 : f32
    %25 = vector.broadcast %cst_9 : f32 to vector<4x512xf32>
    %26 = arith.mulf %0, %25 : vector<4x512xf32>
    %27 = math.sin %26 : vector<4x512xf32>
    %28 = vector.broadcast %24 : f32 to vector<4x512xf32>
    %29 = arith.mulf %28, %27 : vector<4x512xf32>
    %c20 = arith.constant 20 : index
    %c0_10 = arith.constant 0 : index
    %30 = vector.load %arg3[%c20, %c0_10] : memref<52x512xf32, #tpu.memory_space<vmem>>, vector<4x512xf32>
    tpu.vector_store %arg3[%c20, %c0_10], %29 {strides = array<i32>} : memref<52x512xf32, #tpu.memory_space<vmem>>, vector<4x512xf32>,
    %31 = math.cos %26 : vector<4x512xf32>
    %32 = vector.broadcast %24 : f32 to vector<4x512xf32>
    %33 = arith.mulf %32, %31 : vector<4x512xf32>
    %c24 = arith.constant 24 : index
    %c0_11 = arith.constant 0 : index
    %34 = vector.load %arg3[%c24, %c0_11] : memref<52x512xf32, #tpu.memory_space<vmem>>, vector<4x512xf32>
    tpu.vector_store %arg3[%c24, %c0_11], %33 {strides = array<i32>} : memref<52x512xf32, #tpu.memory_space<vmem>>, vector<4x512xf32>,
    %c3 = arith.constant 3 : index
    %35 = memref.load %arg1[%c3] : memref<6xf32, #tpu.memory_space<smem>>
    %cst_12 = arith.constant 1.600000e+01 : f32
    %36 = vector.broadcast %cst_12 : f32 to vector<4x512xf32>
    %37 = arith.mulf %0, %36 : vector<4x512xf32>
    %38 = math.sin %37 : vector<4x512xf32>
    %39 = vector.broadcast %35 : f32 to vector<4x512xf32>
    %40 = arith.mulf %39, %38 : vector<4x512xf32>
    %c28 = arith.constant 28 : index
    %c0_13 = arith.constant 0 : index
    %41 = vector.load %arg3[%c28, %c0_13] : memref<52x512xf32, #tpu.memory_space<vmem>>, vector<4x512xf32>
    tpu.vector_store %arg3[%c28, %c0_13], %40 {strides = array<i32>} : memref<52x512xf32, #tpu.memory_space<vmem>>, vector<4x512xf32>,
    %42 = math.cos %37 : vector<4x512xf32>
    %43 = vector.broadcast %35 : f32 to vector<4x512xf32>
    %44 = arith.mulf %43, %42 : vector<4x512xf32>
    %c32 = arith.constant 32 : index
    %c0_14 = arith.constant 0 : index
    %45 = vector.load %arg3[%c32, %c0_14] : memref<52x512xf32, #tpu.memory_space<vmem>>, vector<4x512xf32>
    tpu.vector_store %arg3[%c32, %c0_14], %44 {strides = array<i32>} : memref<52x512xf32, #tpu.memory_space<vmem>>, vector<4x512xf32>,
    %c4_15 = arith.constant 4 : index
    %46 = memref.load %arg1[%c4_15] : memref<6xf32, #tpu.memory_space<smem>>
    %cst_16 = arith.constant 3.200000e+01 : f32
    %47 = vector.broadcast %cst_16 : f32 to vector<4x512xf32>
    %48 = arith.mulf %0, %47 : vector<4x512xf32>
    %49 = math.sin %48 : vector<4x512xf32>
    %50 = vector.broadcast %46 : f32 to vector<4x512xf32>
    %51 = arith.mulf %50, %49 : vector<4x512xf32>
    %c36 = arith.constant 36 : index
    %c0_17 = arith.constant 0 : index
    %52 = vector.load %arg3[%c36, %c0_17] : memref<52x512xf32, #tpu.memory_space<vmem>>, vector<4x512xf32>
    tpu.vector_store %arg3[%c36, %c0_17], %51 {strides = array<i32>} : memref<52x512xf32, #tpu.memory_space<vmem>>, vector<4x512xf32>,
    %53 = math.cos %48 : vector<4x512xf32>
    %54 = vector.broadcast %46 : f32 to vector<4x512xf32>
    %55 = arith.mulf %54, %53 : vector<4x512xf32>
    %c40 = arith.constant 40 : index
    %c0_18 = arith.constant 0 : index
    %56 = vector.load %arg3[%c40, %c0_18] : memref<52x512xf32, #tpu.memory_space<vmem>>, vector<4x512xf32>
    tpu.vector_store %arg3[%c40, %c0_18], %55 {strides = array<i32>} : memref<52x512xf32, #tpu.memory_space<vmem>>, vector<4x512xf32>,
    %c5 = arith.constant 5 : index
    %57 = memref.load %arg1[%c5] : memref<6xf32, #tpu.memory_space<smem>>
    %cst_19 = arith.constant 6.400000e+01 : f32
    %58 = vector.broadcast %cst_19 : f32 to vector<4x512xf32>
    %59 = arith.mulf %0, %58 : vector<4x512xf32>
    %60 = math.sin %59 : vector<4x512xf32>
    %61 = vector.broadcast %57 : f32 to vector<4x512xf32>
    %62 = arith.mulf %61, %60 : vector<4x512xf32>
    %c44 = arith.constant 44 : index
    %c0_20 = arith.constant 0 : index
    %63 = vector.load %arg3[%c44, %c0_20] : memref<52x512xf32, #tpu.memory_space<vmem>>, vector<4x512xf32>
    tpu.vector_store %arg3[%c44, %c0_20], %62 {strides = array<i32>} : memref<52x512xf32, #tpu.memory_space<vmem>>, vector<4x512xf32>,
    %64 = math.cos %59 : vector<4x512xf32>
    %65 = vector.broadcast %57 : f32 to vector<4x512xf32>
    %66 = arith.mulf %65, %64 : vector<4x512xf32>
    %c48 = arith.constant 48 : index
    %c0_21 = arith.constant 0 : index
    %67 = vector.load %arg3[%c48, %c0_21] : memref<52x512xf32, #tpu.memory_space<vmem>>, vector<4x512xf32>
    tpu.vector_store %arg3[%c48, %c0_21], %66 {strides = array<i32>} : memref<52x512xf32, #tpu.memory_space<vmem>>, vector<4x512xf32>,
    return
  }
  func.func @transform_0(%arg0: i32) -> i32 {
    %c0_i32 = arith.constant 0 : i32
    %c0_i32_0 = arith.constant 0 : i32
    return %c0_i32 : i32
  }
  func.func @transform_1(%arg0: i32) -> (i32, i32) {
    %c0_i32 = arith.constant 0 : i32
    %c0_i32_0 = arith.constant 0 : i32
    return %c0_i32, %arg0 : i32, i32
  }
  func.func @transform_2(%arg0: i32) -> (i32, i32) {
    %c0_i32 = arith.constant 0 : i32
    %c0_i32_0 = arith.constant 0 : i32
    return %c0_i32, %arg0 : i32, i32
  }
}

</mosaic_0001>

<bundles_post_ra>
// kernel: windowed_pe.1
= control target key start
LH: loop header
LB: loop body
LE: loop exit
PB: predicated region body
PF: predicated region fallthrough
CT: control target
= control target key end

     0   :  { %7 = vsyncpa [#allocation3], 0  ;;  %s4295_s0 = inlined_call_operand.vmem [shape: f32[6], index: 0, kind: input, shape index: {}]   ;;  %s4296_s1 = inlined_call_operand.vmem [shape: f32[4,512], index: 1, kind: input, shape index: {}]   ;;  %s4297_s2 = inlined_call_operand.vmem [shape: f32[52,512], index: 2, kind: output, shape index: {}]  }
   0x1   :  { %s14_s11 = sshll.u32 %s4295_s0, 4  ;;  %s15_s11 = int_to_ptr.vmem [resolvable:$true] %s14_s11 }
   0x2   :  { %s2899_s12 = scalar_lea.vmem %s15_s11, 16  ;;  %p2904_p1 = scmp.lt.s32.totalorder %s15_s11, %s15_s11 }
   0x3   :  { %p2900_p0 = scmp.ne.s32.totalorder %s15_s11, %s2899_s12  ;;  %p2905_p2 = scmp.lt.s32.totalorder %s2899_s12, %s2899_s12 }
   0x5   :  { %p2906_p3 = por %p2905_p2, %p2904_p1 }
   0x7   :  { %p2907_p4 = pnand %p2906_p3, %p2900_p0 }
   0x9   :  { %2910 = shalt.err (!%p2907_p4)
}
   0xa   :  { %s2913_s13 = smov [#allocation2]  }
   0xb   :  { %17 = dma.vmem_to_smem %s15_s11, 16, %s2913_s13, [#allocation3]  }
   0xc   :  { %2911 = dma.done.wait [#allocation3], 16  }
   0xd   :  { %2912 = vsyncadd [#allocation3], 4294967280 }
   0xe   :  { %23 = sfence }
   0xf   :  { %v2941_v0 = vld [vmem:[%s4296_s1] sm:$0xff]  ;;  %v2946_v1 = vld [vmem:[%s4296_s1 + $0x8] sm:$0xff]  ;;  %v2914_v30 = vmov 683565275   ;;  %v2915_v32 = vmov 2475754826  }
  0x10   :  { %32 = vst [vmem:[%s4297_s2] sm:$0xf] %v2941_v0  ;;  %v28_v2 = vcombine.high %v2941_v0, %v2941_v0  ;;  %34 = vst [vmem:[%s4297_s2 + $0x10] sm:$0xf] %v2946_v1  ;;  %v29_v3 = vcombine.high %v2946_v1, %v2946_v1  ;;  %v2961_v4 = vmul.f32 2.0, %v2941_v0  ;;  %v2972_v7 = vmul.f32 2.0, %v2946_v1  ;;  %s36_s24 = sld [smem:[#allocation2]] }
  0x11   :  { %v2979_v12 = vmul.f32 4.0, %v2941_v0  ;;  %v2916_v34 = vmov 2131351028   ;;  %v2917_v36 = vmov 2102212464   ;;  %s2709_s5 = sld [smem:[#allocation2 + $0x1]] }
  0x12   :  { %33 = vst [vmem:[%s4297_s2 + $0x8] sm:$0xf] %v28_v2  ;;  %35 = vst [vmem:[%s4297_s2 + $0x18] sm:$0xf] %v29_v3  ;;  %v39_v5 = vand.u32 2147483647, %v2961_v4 }
  0x13   :  { %v42_v6 = vand.u32 2139095040, %v2961_v4  ;;  %v143_v10 = vand.u32 2147483647, %v2972_v7  ;;  %v146_v11 = vand.u32 2139095040, %v2972_v7  ;;  %v484_v20 = vand.u32 2139095040, %v2979_v12  ;;  %s3607_s28 = sld [smem:[#allocation2 + $0x2]] }
  0x14   :  { %v46_v9 = vand.u32 8388607, %v39_v5  ;;  %v481_v25 = vand.u32 2147483647, %v2979_v12  ;;  %v2918_v38 = vmov 920167782  }
  0x15   :  { %v43_v8 = vshrl.u32 %v42_v6, 23  ;;  %v147_v14 = vshrl.u32 %v146_v11, 23  ;;  %v150_v15 = vand.u32 8388607, %v143_v10  ;;  %v2989_v28 = vshrl.u32 %v484_v20, 23  ;;  %s3771_s9 = sld [smem:[#allocation2 + $0x3]] }
  0x16   :  { %v47_v17 = vor.u32 8388608, %v46_v9  ;;  %v2919_v45 = vmov 1326507024   ;;  %vm41_vm13 = vcmp.lt.s32.totalorder %v2961_v4, 0  ;;  %vm3068_vm14 = vcmp.le.f32.partialorder %v39_v5, 0.7853982 }
  0x17   :  { %v2693_v13 = vadd.s32 4294967169, %v43_v8  ;;  %v2697_v18 = vadd.s32 4294967169, %v147_v14  ;;  %v151_v19 = vor.u32 8388608, %v150_v15  ;;  %vm145_vm15 = vcmp.lt.s32.totalorder %v2972_v7, 0  ;;  %s2777_s20 = sld [smem:[#allocation2 + $0x5]] }
  0x18   :  { %v2985_v26 = vshll.u32 %v47_v17, 8 }
  0x19   :  { %v49_v16 = vadd.s32 1, %v2693_v13  ;;  %v153_v22 = vadd.s32 1, %v2697_v18  ;;  %v2987_v27 = vshll.u32 %v151_v19, 8 }
  0x1b   :  { %vm50_vm0 = vcmp.gt.s32.totalorder %v49_v16, 0  ;;  %vm154_vm1 = vcmp.gt.s32.totalorder %v153_v22, 0 }
  0x1c   :  { %v51_v21 = vsel %vm50_vm0, %v49_v16, 0  ;;  %v155_v50 = vsel %vm154_vm1, %v153_v22, 0 }
  0x1d   :  { %v52_v23 = vshrl.u32 %v51_v21, 5  ;;  %v53_v24 = vand.u32 31, %v51_v21  ;;  %v156_v53 = vshrl.u32 %v155_v50, 5  ;;  %v157_v54 = vand.u32 31, %v155_v50 }
  0x1f   :  { %v54_v29 = vsub.s32 32, %v53_v24  ;;  %v56_v31 = vshll.u32 %v2914_v30, %v53_v24  ;;  %v59_v33 = vshll.u32 %v2915_v32, %v53_v24  ;;  %v62_v35 = vshll.u32 %v2916_v34, %v53_v24 }
  0x20   :  { %v65_v37 = vshll.u32 %v2917_v36, %v53_v24  ;;  %v68_v39 = vshll.u32 %v2918_v38, %v53_v24  ;;  %vm71_vm2 = vcmp.lt.s32.totalorder %v52_v23, 1  ;;  %vm72_vm3 = vcmp.lt.s32.totalorder %v52_v23, 2 }
  0x21   :  { %v55_v40 = vshrl.u32 %v2914_v30, %v54_v29  ;;  %v57_v41 = vshrl.u32 %v2915_v32, %v54_v29  ;;  %v60_v42 = vshrl.u32 %v2916_v34, %v54_v29  ;;  %v63_v43 = vshrl.u32 %v2917_v36, %v54_v29 }
  0x22   :  { %v66_v44 = vshrl.u32 %v2918_v38, %v54_v29  ;;  %v69_v46 = vshrl.u32 %v2919_v45, %v54_v29  ;;  %vm73_vm4 = vcmp.lt.s32.totalorder %v52_v23, 3  ;;  %vm74_vm5 = vcmp.lt.s32.totalorder %v52_v23, 4 }
  0x23   :  { %v58_v47 = vor.u32 %v57_v41, %v56_v31  ;;  %v61_v48 = vor.u32 %v60_v42, %v59_v33  ;;  %v64_v49 = vor.u32 %v63_v43, %v62_v35  ;;  %v158_v62 = vsub.s32 32, %v157_v54 }
  0x24   :  { %v67_v51 = vor.u32 %v66_v44, %v65_v37  ;;  %v70_v52 = vor.u32 %v69_v46, %v68_v39  ;;  %v160_v6 = vshll.u32 %v2914_v30, %v157_v54  ;;  %v163_v19 = vshll.u32 %v2915_v32, %v157_v54 }
  0x25   :  { %v75_v55 = vsel %vm71_vm2, %v55_v40, %v58_v47  ;;  %v76_v56 = vsel %vm74_vm5, %v64_v49, 2102212464  ;;  %v79_v57 = vsel %vm71_vm2, %v58_v47, %v61_v48  ;;  %v83_v58 = vsel %vm71_vm2, %v61_v48, %v64_v49 }
  0x26   :  { %v77_v59 = vsel %vm73_vm4, %v61_v48, %v76_v56  ;;  %v80_v60 = vsel %vm74_vm5, %v67_v51, 920167782  ;;  %v84_v61 = vsel %vm74_vm5, %v70_v52, 1326507024  ;;  %v159_v13 = vshrl.u32 %v2914_v30, %v158_v62 }
  0x27   :  { %v78_v63 = vsel %vm72_vm3, %v75_v55, %v77_v59  ;;  %v81_v2 = vsel %vm73_vm4, %v64_v49, %v80_v60  ;;  %v85_v3 = vsel %vm73_vm4, %v67_v51, %v84_v61  ;;  %v161_v18 = vshrl.u32 %v2915_v32, %v158_v62 }
  0x28   :  { %v82_v8 = vsel %vm72_vm3, %v79_v57, %v81_v2  ;;  %v86_v9 = vsel %vm72_vm3, %v83_v58, %v85_v3  ;;  %v94_v11 = vmul.u32 %v2985_v26, %v78_v63  ;;  %v164_v20 = vshrl.u32 %v2916_v34, %v158_v62 }
  0x29   :  { %v3016_v14 = vmul.u32.u64.low %v2985_v26, %v86_v9  ;;  %v3017_v15 = vmul.u32.u64.high %v2985_v26, %v86_v9, %v3016_v14  ;;  %v3020_v16 = vmul.u32.u64.low %v2985_v26, %v82_v8  ;;  %v3021_v17 = vmul.u32.u64.high %v2985_v26, %v82_v8, %v3020_v16 }
  0x2a   :  { %v166_v21 = vshll.u32 %v2916_v34, %v157_v54  ;;  %v167_v22 = vshrl.u32 %v2917_v36, %v158_v62  ;;  %v169_v23 = vshll.u32 %v2917_v36, %v157_v54  ;;  %v170_v24 = vshrl.u32 %v2918_v38, %v158_v62 }
  0x2b   :  { %v172_v29 = vshll.u32 %v2918_v38, %v157_v54  ;;  %v162_v31 = vor.u32 %v161_v18, %v160_v6  ;;  %v165_v26 = vor.u32 %v164_v20, %v163_v19  ;;  %v173_v33 = vshrl.u32 %v2919_v45, %v158_v62 }
  0x2c   :  { %vm175_vm6 = vcmp.lt.s32.totalorder %v156_v53, 1  ;;  %vm96_vm7 = vc.u32 %v3017_v15, %v3020_v16  ;;  %v97_v35 = vadd.s32 1, %v3021_v17  ;;  %v168_v37 = vor.u32 %v167_v22, %v166_v21 }
  0x2d   :  { %v2710_v39 = vadd.s32 4294967169, %v2989_v28  ;;  %v171_v40 = vor.u32 %v170_v24, %v169_v23  ;;  %v174_v41 = vor.u32 %v173_v33, %v172_v29  ;;  %vm176_vm8 = vcmp.lt.s32.totalorder %v156_v53, 2 }
  0x2e   :  { %vm177_vm9 = vcmp.lt.s32.totalorder %v156_v53, 3  ;;  %v98_v42 = vsel %vm96_vm7, %v97_v35, %v3021_v17  ;;  %vm178_vm10 = vcmp.lt.s32.totalorder %v156_v53, 4  ;;  %v179_v43 = vsel %vm175_vm6, %v159_v13, %v162_v31 }
  0x2f   :  { %v183_v44 = vsel %vm175_vm6, %v162_v31, %v165_v26  ;;  %v99_v46 = vadd.s32 %v98_v42, %v94_v11  ;;  %v180_v47 = vsel %vm178_vm10, %v168_v37, 2102212464  ;;  %v184_v48 = vsel %vm178_vm10, %v171_v40, 920167782 }
  0x30   :  { %v187_v49 = vsel %vm175_vm6, %v165_v26, %v168_v37  ;;  %v181_v50 = vsel %vm177_vm9, %v165_v26, %v180_v47  ;;  %v185_v51 = vsel %vm177_vm9, %v168_v37, %v184_v48  ;;  %v188_v52 = vsel %vm178_vm10, %v174_v41, 1326507024 }
  0x31   :  { %v491_v28 = vadd.s32 1, %v2710_v39  ;;  %v100_v54 = vadd.s32 536870912, %v99_v46  ;;  %v186_v55 = vsel %vm176_vm8, %v183_v44, %v185_v51  ;;  %v189_v56 = vsel %vm177_vm9, %v171_v40, %v188_v52 }
  0x32   :  { %v3043_v57 = vmul.f32 4.0, %v2946_v1  ;;  %v182_v58 = vsel %vm176_vm8, %v179_v43, %v181_v50  ;;  %v190_v59 = vsel %vm176_vm8, %v187_v49, %v189_v56  ;;  %v488_v3 = vand.u32 8388607, %v481_v25 }
  0x33   :  { %v3048_v60 = vmul.u32.u64.low %v2987_v27, %v186_v55  ;;  %v3049_v61 = vmul.u32.u64.high %v2987_v27, %v186_v55, %v3048_v60  ;;  %v101_v62 = vshrl.u32 %v100_v54, 30  ;;  %vm492_vm11 = vcmp.gt.s32.totalorder %v491_v28, 0 }
  0x34   :  { %v3052_v63 = vmul.u32.u64.low %v2987_v27, %v190_v59  ;;  %v3053_v2 = vmul.u32.u64.high %v2987_v27, %v190_v59, %v3052_v63  ;;  %v493_v6 = vsel %vm492_vm11, %v491_v28, 0  ;;  %v198_v9 = vmul.u32 %v2987_v27, %v182_v58 }
  0x35   :  { %v102_v8 = vshll.u32 %v101_v62, 30  ;;  %v201_v53 = vadd.s32 1, %v3049_v61  ;;  %v588_v11 = vand.u32 2139095040, %v3043_v57  ;;  %v125_v14 = vsub.s32 4, %v101_v62 }
  0x36   :  { %vm200_vm12 = vc.u32 %v3053_v2, %v3048_v60  ;;  %v495_v17 = vand.u32 31, %v493_v6  ;;  %v489_v19 = vor.u32 8388608, %v488_v3  ;;  %v585_v22 = vand.u32 2147483647, %v3043_v57 }
  0x37   :  { %v103_v13 = vsub.s32 %v99_v46, %v102_v8  ;;  %v202_v18 = vsel %vm200_vm12, %v201_v53, %v3049_v61  ;;  %v589_v23 = vshrl.u32 %v588_v11, 23  ;;  %v126_v24 = vsel %vm41_vm13, %v125_v14, %v101_v62 }
  0x38   :  { %v203_v21 = vadd.s32 %v202_v18, %v198_v9  ;;  %v496_v31 = vsub.s32 32, %v495_v17  ;;  %v3072_v33 = vstv %s36_s24  ;;  %v3074_v35 = vshll.u32 %v489_v19, 8  ;;  %s4026_s24 = sld [smem:[#allocation2 + $0x4]] }
  0x39   :  { %v105_v20 = vsub.s32 0, %v103_v13  ;;  %v3077_v37 = vmul.f32 8.0, %v2941_v0  ;;  %v95_v39 = vadd.s32 %v3020_v16, %v3017_v15  ;;  %v3081_v41 = vshrl.u32 %v493_v6, 5 }
  0x3a   :  { %v204_v29 = vadd.s32 536870912, %v203_v21  ;;  %v3085_v42 = vand.u32 8388607, %v585_v22  ;;  %v3089_v5 = vsel %vm3068_vm14, 0, %v126_v24  ;;  %v3092_v43 = vadd.s32 %v3048_v60, %v3053_v2 }
  0x3b   :  { %v2694_v27 = vmin.u32 %v105_v20, %v103_v13  ;;  %v2714_v46 = vadd.s32 4294967169, %v589_v23  ;;  %v498_v48 = vshll.u32 %v2914_v30, %v495_v17  ;;  %v504_v15 = vshll.u32 %v2916_v34, %v495_v17 }
  0x3c   :  { %v205_v44 = vshrl.u32 %v204_v29, 30  ;;  %v505_v16 = vshrl.u32 %v2917_v36, %v496_v31  ;;  %v499_v50 = vshrl.u32 %v2915_v32, %v496_v31  ;;  %v501_v51 = vshll.u32 %v2915_v32, %v495_v17 }
  0x3d   :  { %v107_v40 = vclz %v2694_v27  ;;  %v502_v52 = vshrl.u32 %v2916_v34, %v496_v31  ;;  %v497_v28 = vshrl.u32 %v2914_v30, %v496_v31  ;;  %v507_v54 = vshll.u32 %v2917_v36, %v495_v17 }
  0x3e   :  { %v206_v49 = vshll.u32 %v205_v44, 30  ;;  %v508_v55 = vshrl.u32 %v2918_v38, %v496_v31  ;;  %v510_v59 = vshll.u32 %v2918_v38, %v495_v17  ;;  %v511_v60 = vshrl.u32 %v2919_v45, %v496_v31 }
  0x3f   :  { %v2695_v47 = vadd.s32 4294967294, %v107_v40  ;;  %v506_v2 = vor.u32 %v505_v16, %v504_v15  ;;  %v500_v6 = vor.u32 %v499_v50, %v498_v48  ;;  %v503_v8 = vor.u32 %v502_v52, %v501_v51 }
  0x40   :  { %v3104_v58 = vsub.s32 %v203_v21, %v206_v49  ;;  %vm516_vm1 = vcmp.lt.s32.totalorder %v3081_v41, 4  ;;  %v229_v11 = vsub.s32 4, %v205_v44  ;;  %v509_v18 = vor.u32 %v508_v55, %v507_v54 }
  0x41   :  { %vm2696_vm0 = vcmp.lt.s32.totalorder %v2695_v47, 0  ;;  %v518_v14 = vsel %vm516_vm1, %v506_v2, 2102212464  ;;  %v512_v19 = vor.u32 %v511_v60, %v510_v59  ;;  %vm513_vm2 = vcmp.lt.s32.totalorder %v3081_v41, 1 }
  0x42   :  { %v110_v56 = vsel %vm2696_vm0, 0, %v2695_v47  ;;  %v209_v3 = vsub.s32 0, %v3104_v58  ;;  %v132_v21 = vadd.s32 3, %v3089_v5  ;;  %vm515_vm3 = vcmp.lt.s32.totalorder %v3081_v41, 3 }
  0x43   :  { %v111_v61 = vsub.s32 32, %v110_v56  ;;  %v112_v62 = vshll.u32 %v103_v13, %v110_v56  ;;  %v115_v63 = vsub.s32 4294967266, %v110_v56  ;;  %vm3118_vm4 = vcmp.le.f32.partialorder %v143_v10, 0.7853982 }
  0x44   :  { %v2698_v17 = vmin.u32 %v209_v3, %v3104_v58  ;;  %vm514_vm5 = vcmp.lt.s32.totalorder %v3081_v41, 2  ;;  %v517_v24 = vsel %vm513_vm2, %v497_v28, %v500_v6  ;;  %v519_v29 = vsel %vm515_vm3, %v503_v8, %v518_v14 }
  0x45   :  { %v113_v9 = vshrl.u32 %v95_v39, %v111_v61  ;;  %v116_v53 = vadd.s32 127, %v115_v63  ;;  %v230_v40 = vsel %vm145_vm15, %v229_v11, %v205_v44  ;;  %v521_v10 = vsel %vm513_vm2, %v500_v6, %v503_v8 }
  0x46   :  { %v211_v27 = vclz %v2698_v17  ;;  %v522_v48 = vsel %vm516_vm1, %v509_v18, 920167782  ;;  %v525_v15 = vsel %vm513_vm2, %v503_v8, %v506_v2  ;;  %v526_v16 = vsel %vm516_vm1, %v512_v19, 1326507024 }
  0x47   :  { %v114_v13 = vor.u32 %v113_v9, %v112_v62  ;;  %v117_v20 = vshll.u32 %v116_v53, 23  ;;  %v520_v50 = vsel %vm514_vm5, %v517_v24, %v519_v29  ;;  %v523_v44 = vsel %vm515_vm3, %v506_v2, %v522_v48 }
  0x48   :  { %v2699_v47 = vadd.s32 4294967294, %v211_v27  ;;  %v527_v51 = vsel %vm515_vm3, %v509_v18, %v526_v16  ;;  %v524_v52 = vsel %vm514_vm5, %v521_v10, %v523_v44  ;;  %v595_v54 = vadd.s32 1, %v2714_v46 }
  0x49   :  { %v118_v31 = vor.u32 4788187, %v117_v20  ;;  %v121_v39 = vcvt.s32.f32 %v114_v13  ;;  %v528_v28 = vsel %vm514_vm5, %v525_v15, %v527_v51  ;;  %v593_v9 = vor.u32 8388608, %v3085_v42 }
  0x4a   :  { %vm2700_vm6 = vcmp.lt.s32.totalorder %v2699_v47, 0  ;;  %v3148_v59 = vmul.u32.u64.low %v3074_v35, %v528_v28  ;;  %v3149_v60 = vmul.u32.u64.high %v3074_v35, %v528_v28, %v3148_v59  ;;  %vm596_vm7 = vcmp.gt.s32.totalorder %v595_v54, 0 }
  0x4b   :  { %v119_v49 = vand.u32 2147483647, %v118_v31  ;;  %v214_v56 = vsel %vm2700_vm6, 0, %v2699_v47  ;;  %v3153_v3 = vmul.u32.u64.low %v3074_v35, %v524_v52  ;;  %v3154_v6 = vmul.u32.u64.high %v3074_v35, %v524_v52, %v3153_v3 }
  0x4c   :  { %v215_v61 = vsub.s32 32, %v214_v56  ;;  %v216_v62 = vshll.u32 %v3104_v58, %v214_v56  ;;  %v219_v63 = vsub.s32 4294967266, %v214_v56  ;;  %v597_v41 = vsel %vm596_vm7, %v595_v54, 0 }
  0x4d   :  { %v122_v55 = vmul.f32 %v121_v39, %v119_v49  ;;  %v599_v53 = vand.u32 31, %v597_v41  ;;  %v232_v58 = vsel %vm3118_vm4, 0, %v230_v40  ;;  %v3164_v14 = vand.u32 3, %v3089_v5 }
  0x4e   :  { %v217_v46 = vshrl.u32 %v3092_v43, %v215_v61  ;;  %v220_v8 = vadd.s32 127, %v219_v63  ;;  %v536_v17 = vmul.u32 %v3074_v35, %v520_v50  ;;  %vm538_vm8 = vc.u32 %v3149_v60, %v3153_v3 }
  0x4f   :  { %v123_v2 = vxor.u32 2147483648, %v122_v55  ;;  %v3172_v13 = vand.u32 3, %v132_v21  ;;  %v539_v20 = vadd.s32 1, %v3154_v6  ;;  %v600_v27 = vsub.s32 32, %v599_v53 }
  0x50   :  { %v218_v43 = vor.u32 %v217_v46, %v216_v62  ;;  %v221_v19 = vshll.u32 %v220_v8, 23  ;;  %v923_v35 = vand.u32 2147483647, %v3077_v37  ;;  %v236_v29 = vadd.s32 3, %v232_v58 }
  0x51   :  { %v124_v11 = vsel %vm41_vm13, %v123_v2, %v122_v55  ;;  %vm358_vm9 = vcmp.eq.s32.totalorder %v3164_v14, 2  ;;  %v540_v26 = vsel %vm538_vm8, %v539_v20, %v3154_v6  ;;  %v3178_v31 = vshrl.u32 %v597_v41, 5 }
  0x52   :  { %v127_v18 = vsel %vm3068_vm14, %v2961_v4, %v124_v11  ;;  %v222_v5 = vor.u32 4788187, %v221_v19  ;;  %v225_v24 = vcvt.s32.f32 %v218_v43  ;;  %vm355_vm10 = vcmp.eq.s32.totalorder %v3164_v14, 0 }
  0x53   :  { %2851 = vcosq.f32 %v127_v18  ;;  %v541_v21 = vadd.s32 %v540_v26, %v536_v17  ;;  %v602_v40 = vshll.u32 %v2914_v30, %v599_v53  ;;  %v611_v10 = vshll.u32 %v2917_v36, %v599_v53 }
  0x54   :  { %2853 = vsinq.f32 %v127_v18  ;;  %v223_v39 = vand.u32 2147483647, %v222_v5  ;;  %vm134_vm11 = vcmp.lt.s32.totalorder %v3172_v13, 2  ;;  %vm354_vm12 = vcmp.lt.s32.totalorder %v3164_v14, 2 }
  0x55   :  { %v603_v47 = vshrl.u32 %v2915_v32, %v600_v27  ;;  %v605_v48 = vshll.u32 %v2915_v32, %v599_v53  ;;  %v606_v15 = vshrl.u32 %v2916_v34, %v600_v27  ;;  %v612_v16 = vshrl.u32 %v2918_v38, %v600_v27 }
  0x56   :  { %vm131_vm13 = vweird.f32 %v2961_v4  ;;  %v226_v49 = vmul.f32 %v225_v24, %v223_v39  ;;  %v542_v50 = vadd.s32 536870912, %v541_v21  ;;  %v608_v44 = vshll.u32 %v2916_v34, %v599_v53 }
  0x57   :  { %v609_v51 = vshrl.u32 %v2917_v36, %v600_v27  ;;  %vm135_vm14 = vcmp.eq.s32.totalorder %v3172_v13, 0  ;;  %vm138_vm0 = vcmp.eq.s32.totalorder %v3172_v13, 2  ;;  %v614_v52 = vshll.u32 %v2918_v38, %v599_v53 }
  0x58   :  { %v615_v28 = vshrl.u32 %v2919_v45, %v600_v27  ;;  %v227_v54 = vxor.u32 2147483648, %v226_v49  ;;  %v3196_v55 = vand.u32 3, %v232_v58  ;;  %v3198_v56 = vshrl.u32 %v542_v50, 30 }
  0x59   :  { %v613_v59 = vor.u32 %v612_v16, %v611_v10  ;;  %v3200_v61 = vand.u32 3, %v236_v29  ;;  %v601_v62 = vshrl.u32 %v2914_v30, %v600_v27  ;;  %v604_v63 = vor.u32 %v603_v47, %v602_v40 }
  0x5a   :  { %vm620_vm1 = vcmp.lt.s32.totalorder %v3178_v31, 4  ;;  %v228_v2 = vsel %vm145_vm15, %v227_v54, %v226_v49  ;;  %v544_v6 = vshll.u32 %v3198_v56, 30  ;;  %v607_v41 = vor.u32 %v606_v15, %v605_v48 }
  0x5b   :  { %v610_v46 = vor.u32 %v609_v51, %v608_v44  ;;  %v231_v53 = vsel %vm3118_vm4, %v2972_v7, %v228_v2  ;;  %v616_v11 = vor.u32 %v615_v28, %v614_v52  ;;  %vm617_vm2 = vcmp.lt.s32.totalorder %v3178_v31, 1 }
  0x5c   :  { %vm619_vm3 = vcmp.lt.s32.totalorder %v3178_v31, 3  ;;  %2855 = vcosq.f32 %v231_v53  ;;  %v3212_v18 = vsub.s32 %v541_v21, %v544_v6  ;;  %v626_v43 = vsel %vm620_vm1, %v613_v59, 920167782 }
  0x5d   :  { %v2852_v8 = vpop.eup %2851  ;;  %2857 = vsinq.f32 %v231_v53  ;;  %vm618_vm15 = vcmp.lt.s32.totalorder %v3178_v31, 2  ;;  %v622_v23 = vsel %vm620_vm1, %v610_v46, 2102212464  ;;  %vm461_vm4 = vcmp.eq.s32.totalorder %v3196_v55, 2 }
  0x5e   :  { %v2854_v58 = vpop.eup %2853  ;;  %v139_v17 = vxor.u32 2147483648, %v2852_v8  ;;  %vm483_vm5 = vcmp.lt.s32.totalorder %v2979_v12, 0  ;;  %v547_v5 = vsub.s32 0, %v3212_v18  ;;  %v625_v24 = vsel %vm617_vm2, %v604_v63, %v607_v41 }
  0x5f   :  { %v136_v19 = vxor.u32 2147483648, %v2854_v58  ;;  %vm458_vm6 = vcmp.eq.s32.totalorder %v3196_v55, 0  ;;  %v627_v39 = vsel %vm619_vm3, %v610_v46, %v626_v43  ;;  %v630_v21 = vsel %vm620_vm1, %v616_v11, 1326507024 }
  0x60   :  { %v140_v20 = vsel %vm138_vm0, %v139_v17, %v2854_v58  ;;  %v360_v27 = vsel %vm358_vm9, %v139_v17, %v2854_v58  ;;  %vm238_vm7 = vcmp.lt.s32.totalorder %v3200_v61, 2  ;;  %vm457_vm8 = vcmp.lt.s32.totalorder %v3196_v55, 2 }
  0x61   :  { %v137_v29 = vsel %vm135_vm14, %v2852_v8, %v136_v19  ;;  %v357_v26 = vsel %vm355_vm10, %v2852_v8, %v136_v19  ;;  %v2711_v47 = vmin.u32 %v547_v5, %v3212_v18  ;;  %v629_v48 = vsel %vm617_vm2, %v607_v41, %v610_v46 }
  0x62   :  { %v141_v40 = vsel %vm134_vm11, %v137_v29, %v140_v20  ;;  %v361_v10 = vsel %vm354_vm12, %v357_v26, %v360_v27  ;;  %vm235_vm9 = vweird.f32 %v2972_v7  ;;  %v631_v16 = vsel %vm619_vm3, %v613_v59, %v630_v21 }
  0x63   :  { %v142_v15 = vsel %vm131_vm13, nan, %v141_v40  ;;  %v362_v13 = vsel %vm131_vm13, nan, %v361_v10  ;;  %v633_v14 = vshll.u32 %v593_v9, 8  ;;  %v549_v44 = vclz %v2711_v47 }
  0x64   :  { %v248_v49 = vmul.f32 %v3072_v33, %v142_v15  ;;  %v466_v50 = vmul.f32 %v362_v13, %v3072_v33  ;;  %v628_v51 = vsel %vm618_vm15, %v625_v24, %v627_v39  ;;  %v567_v52 = vsub.s32 4, %v3198_v56 }
  0x65   :  { %v621_v4 = vsel %vm617_vm2, %v601_v62, %v604_v63  ;;  %v623_v28 = vsel %vm619_vm3, %v607_v41, %v622_v23  ;;  %v632_v42 = vsel %vm618_vm15, %v629_v48, %v631_v16  ;;  %vm239_vm10 = vcmp.eq.s32.totalorder %v3200_v61, 0 }
  0x66   :  { %v252_v9 = vcombine.low %v248_v49, %v248_v49  ;;  %257 = vst [vmem:[%s4297_s2 + $0x8] sm:$0xf0] %v248_v49  ;;  %474 = vst [vmem:[%s4297_s2 + $0x20] sm:$0xf] %v466_v50  ;;  %v470_v54 = vcombine.high %v466_v50, %v466_v50  ;;  %v2712_v59 = vadd.s32 4294967294, %v549_v44  ;;  %v2856_v46 = vpop.eup %2855  ;;  %vm242_vm12 = vcmp.eq.s32.totalorder %v3200_v61, 2 }
  0x67   :  { %vm3275_vm11 = vcmp.le.f32.partialorder %v481_v25, 0.7853982  ;;  %v3279_v63 = vmul.u32.u64.low %v633_v14, %v632_v42  ;;  %v3280_v2 = vmul.u32.u64.high %v633_v14, %v632_v42, %v3279_v63  ;;  %v537_v25 = vadd.s32 %v3153_v3, %v3149_v60  ;;  %v2858_v53 = vpop.eup %2857 }
  0x68   :  { %v3282_v6 = vmul.u32.u64.low %v633_v14, %v628_v51  ;;  %v3283_v41 = vmul.u32.u64.high %v633_v14, %v628_v51, %v3282_v6  ;;  %256 = vst [vmem:[%s4297_s2] sm:$0xf0] %v252_v9  ;;  %475 = vst [vmem:[%s4297_s2 + $0x28] sm:$0xf] %v470_v54  ;;  %vm2713_vm13 = vcmp.lt.s32.totalorder %v2712_v59, 0  ;;  %v624_v8 = vsel %vm618_vm15, %v621_v4, %v623_v28 }
  0x69   :  { %v243_v11 = vxor.u32 2147483648, %v2856_v46  ;;  %v552_v58 = vsel %vm2713_vm13, 0, %v2712_v59  ;;  %v568_v17 = vsel %vm483_vm5, %v567_v52, %v3198_v56  ;;  %v926_v43 = vand.u32 2139095040, %v3077_v37 }
  0x6a   :  { %v240_v19 = vxor.u32 2147483648, %v2858_v53  ;;  %v553_v23 = vsub.s32 32, %v552_v58  ;;  %v554_v20 = vshll.u32 %v3212_v18, %v552_v58  ;;  %v557_v27 = vsub.s32 4294967266, %v552_v58 }
  0x6b   :  { %v244_v60 = vsel %vm242_vm12, %v243_v11, %v2858_v53  ;;  %v463_v3 = vsel %vm461_vm4, %v243_v11, %v2858_v53  ;;  %v640_v31 = vmul.u32 %v633_v14, %v624_v8  ;;  %vm642_vm14 = vc.u32 %v3280_v2, %v3282_v6 }
  0x6c   :  { %v241_v56 = vsel %vm239_vm10, %v2856_v46, %v240_v19  ;;  %v460_v5 = vsel %vm458_vm6, %v2856_v46, %v240_v19  ;;  %v555_v24 = vshrl.u32 %v537_v25, %v553_v23  ;;  %v558_v29 = vadd.s32 127, %v557_v27 }
  0x6d   :  { %v245_v18 = vsel %vm238_vm7, %v241_v56, %v244_v60  ;;  %v464_v26 = vsel %vm457_vm8, %v460_v5, %v463_v3  ;;  %v643_v39 = vadd.s32 1, %v3283_v41  ;;  %v927_v21 = vshrl.u32 %v926_v43, 23 }
  0x6e   :  { %v246_v40 = vsel %vm235_vm9, nan, %v245_v18  ;;  %v465_v10 = vsel %vm235_vm9, nan, %v464_v26  ;;  %v556_v47 = vor.u32 %v555_v24, %v554_v20  ;;  %v559_v48 = vshll.u32 %v558_v29, 23 }
  0x6f   :  { %v249_v15 = vmul.f32 %v3072_v33, %v246_v40  ;;  %v467_v61 = vmul.f32 %v465_v10, %v3072_v33  ;;  %v644_v55 = vsel %vm642_vm14, %v643_v39, %v3283_v41  ;;  %v2727_v13 = vadd.s32 4294967169, %v927_v21 }
  0x70   :  { %v560_v16 = vor.u32 4788187, %v559_v48  ;;  %v563_v14 = vcvt.s32.f32 %v556_v47  ;;  %v570_v49 = vsel %vm3275_vm11, 0, %v568_v17  ;;  %v645_v50 = vadd.s32 %v644_v55, %v640_v31 }
  0x71   :  { %v253_v7 = vcombine.low %v249_v15, %v249_v15  ;;  %259 = vst [vmem:[%s4297_s2 + $0x18] sm:$0xf0] %v249_v15  ;;  %476 = vst [vmem:[%s4297_s2 + $0x30] sm:$0xf] %v467_v61  ;;  %v471_v33 = vcombine.high %v467_v61, %v467_v61  ;;  %v933_v44 = vadd.s32 1, %v2727_v13  ;;  %v574_v4 = vadd.s32 3, %v570_v49 }
  0x72   :  { %v561_v51 = vand.u32 2147483647, %v560_v16  ;;  %v646_v52 = vadd.s32 536870912, %v645_v50  ;;  %v930_v28 = vand.u32 8388607, %v923_v35  ;;  %v3343_v59 = vstv %s2709_s5 }
  0x73   :  { %258 = vst [vmem:[%s4297_s2 + $0x10] sm:$0xf0] %v253_v7  ;;  %477 = vst [vmem:[%s4297_s2 + $0x38] sm:$0xf] %v471_v33  ;;  %vm934_vm0 = vcmp.gt.s32.totalorder %v933_v44, 0  ;;  %vm587_vm2 = vcmp.lt.s32.totalorder %v3043_v57, 0  ;;  %v641_v18 = vadd.s32 %v3282_v6, %v3280_v2  ;;  %vm573_vm8 = vweird.f32 %v2979_v12 }
  0x74   :  { %v564_v42 = vmul.f32 %v563_v14, %v561_v51  ;;  %v647_v9 = vshrl.u32 %v646_v52, 30  ;;  %v935_v54 = vsel %vm934_vm0, %v933_v44, 0  ;;  %vm3347_vm1 = vcmp.le.f32.partialorder %v585_v22, 0.7853982 }
  0x75   :  { %v937_v41 = vand.u32 31, %v935_v54  ;;  %v3352_v53 = vand.u32 3, %v574_v4  ;;  %v3354_v11 = vand.u32 3, %v570_v49  ;;  %v931_v58 = vor.u32 8388608, %v930_v28 }
  0x76   :  { %v565_v46 = vxor.u32 2147483648, %v564_v42  ;;  %v648_v25 = vshll.u32 %v647_v9, 30  ;;  %v671_v8 = vsub.s32 4, %v647_v9  ;;  %v3360_v22 = vshrl.u32 %v935_v54, 5 }
  0x77   :  { %v938_v17 = vsub.s32 32, %v937_v41  ;;  %v3363_v23 = vmul.f32 8.0, %v2946_v1  ;;  %v940_v27 = vshll.u32 %v2914_v30, %v937_v41  ;;  %v943_v3 = vshll.u32 %v2915_v32, %v937_v41 }
  0x78   :  { %v566_v43 = vsel %vm483_vm5, %v565_v46, %v564_v42  ;;  %v3358_v19 = vsub.s32 %v645_v50, %v648_v25  ;;  %v672_v56 = vsel %vm587_vm2, %v671_v8, %v647_v9  ;;  %v946_v5 = vshll.u32 %v2916_v34, %v937_v41 }
  0x79   :  { %v569_v20 = vsel %vm3275_vm11, %v2979_v12, %v566_v43  ;;  %v941_v60 = vshrl.u32 %v2915_v32, %v938_v17  ;;  %v944_v24 = vshrl.u32 %v2916_v34, %v938_v17  ;;  %v947_v62 = vshrl.u32 %v2917_v36, %v938_v17 }
  0x7a   :  { %2859 = vcosq.f32 %v569_v20  ;;  %v651_v31 = vsub.s32 0, %v3358_v19  ;;  %v949_v29 = vshll.u32 %v2917_v36, %v937_v41  ;;  %vm580_vm3 = vcmp.eq.s32.totalorder %v3352_v53, 2 }
  0x7b   :  { %2861 = vsinq.f32 %v569_v20  ;;  %vm800_vm15 = vcmp.eq.s32.totalorder %v3354_v11, 2  ;;  %v3383_v39 = vshll.u32 %v931_v58, 8  ;;  %vm577_vm4 = vcmp.eq.s32.totalorder %v3352_v53, 0 }
  0x7c   :  { %v2715_v26 = vmin.u32 %v651_v31, %v3358_v19  ;;  %vm797_vm5 = vcmp.eq.s32.totalorder %v3354_v11, 0  ;;  %v939_v21 = vshrl.u32 %v2914_v30, %v938_v17  ;;  %v942_v40 = vor.u32 %v941_v60, %v940_v27 }
  0x7d   :  { %v945_v10 = vor.u32 %v944_v24, %v943_v3  ;;  %v950_v47 = vshrl.u32 %v2918_v38, %v938_v17  ;;  %vm576_vm6 = vcmp.lt.s32.totalorder %v3352_v53, 2  ;;  %v3392_v2 = vsel %vm3347_vm1, 0, %v672_v56 }
  0x7e   :  { %v653_v48 = vclz %v2715_v26  ;;  %vm796_vm7 = vcmp.lt.s32.totalorder %v3354_v11, 2  ;;  %v948_v6 = vor.u32 %v947_v62, %v946_v5  ;;  %v1030_v15 = vand.u32 2139095040, %v3363_v23 }
  0x7f   :  { %v951_v61 = vor.u32 %v950_v47, %v949_v29  ;;  %v952_v55 = vshll.u32 %v2918_v38, %v937_v41  ;;  %v953_v13 = vshrl.u32 %v2919_v45, %v938_v17  ;;  %vm955_vm9 = vcmp.lt.s32.totalorder %v3360_v22, 1 }
  0x80   :  { %v2716_v16 = vadd.s32 4294967294, %v653_v48  ;;  %vm956_vm10 = vcmp.lt.s32.totalorder %v3360_v22, 2  ;;  %vm957_vm11 = vcmp.lt.s32.totalorder %v3360_v22, 3  ;;  %vm958_vm12 = vcmp.lt.s32.totalorder %v3360_v22, 4 }
  0x81   :  { %v954_v14 = vor.u32 %v953_v13, %v952_v55  ;;  %v959_v49 = vsel %vm955_vm9, %v939_v21, %v942_v40  ;;  %v960_v50 = vsel %vm958_vm12, %v948_v6, 2102212464  ;;  %v963_v7 = vsel %vm955_vm9, %v942_v40, %v945_v10 }
  0x82   :  { %vm2717_vm13 = vcmp.lt.s32.totalorder %v2716_v16, 0  ;;  %v961_v33 = vsel %vm957_vm11, %v945_v10, %v960_v50  ;;  %v964_v44 = vsel %vm958_vm12, %v951_v61, 920167782  ;;  %v967_v51 = vsel %vm955_vm9, %v945_v10, %v948_v6 }
  0x83   :  { %v656_v52 = vsel %vm2717_vm13, 0, %v2716_v16  ;;  %v962_v4 = vsel %vm956_vm10, %v959_v49, %v961_v33  ;;  %v965_v28 = vsel %vm957_vm11, %v948_v6, %v964_v44  ;;  %v968_v42 = vsel %vm958_vm12, %v954_v14, 1326507024 }
  0x84   :  { %v2860_v9 = vpop.eup %2859  ;;  %v657_v54 = vsub.s32 32, %v656_v52  ;;  %v658_v41 = vshll.u32 %v3358_v19, %v656_v52  ;;  %v661_v46 = vsub.s32 4294967266, %v656_v52  ;;  %v966_v25 = vsel %vm956_vm10, %v963_v7, %v965_v28 }
  0x85   :  { %v2862_v8 = vpop.eup %2861  ;;  %v581_v58 = vxor.u32 2147483648, %v2860_v9  ;;  %v969_v17 = vsel %vm957_vm11, %v951_v61, %v968_v42  ;;  %v3415_v43 = vmul.u32.u64.low %v3383_v39, %v966_v25  ;;  %v3416_v20 = vmul.u32.u64.high %v3383_v39, %v966_v25, %v3415_v43 }
  0x86   :  { %v578_v27 = vxor.u32 2147483648, %v2862_v8  ;;  %v659_v60 = vshrl.u32 %v641_v18, %v657_v54  ;;  %v662_v3 = vadd.s32 127, %v661_v46  ;;  %v970_v31 = vsel %vm956_vm10, %v967_v51, %v969_v17 }
  0x87   :  { %v582_v19 = vsel %vm580_vm3, %v581_v58, %v2862_v8  ;;  %v802_v56 = vsel %vm800_vm15, %v581_v58, %v2862_v8  ;;  %v3425_v5 = vmul.u32.u64.low %v3383_v39, %v970_v31  ;;  %v3426_v24 = vmul.u32.u64.high %v3383_v39, %v970_v31, %v3425_v5 }
  0x88   :  { %v579_v62 = vsel %vm577_vm4, %v2860_v9, %v578_v27  ;;  %v660_v29 = vor.u32 %v659_v60, %v658_v41  ;;  %v663_v26 = vshll.u32 %v662_v3, 23  ;;  %v799_v18 = vsel %vm797_vm5, %v2860_v9, %v578_v27 }
  0x89   :  { %v583_v22 = vsel %vm576_vm6, %v579_v62, %v582_v19  ;;  %v803_v21 = vsel %vm796_vm7, %v799_v18, %v802_v56  ;;  %v978_v40 = vmul.u32 %v3383_v39, %v962_v4  ;;  %v981_v10 = vadd.s32 1, %v3416_v20 }
  0x8a   :  { %v584_v47 = vsel %vm573_vm8, nan, %v583_v22  ;;  %v664_v48 = vor.u32 4788187, %v663_v26  ;;  %v667_v6 = vcvt.s32.f32 %v660_v29  ;;  %v804_v61 = vsel %vm573_vm8, nan, %v803_v21 }
  0x8b   :  { %v690_v55 = vmul.f32 %v3343_v59, %v584_v47  ;;  %v908_v53 = vmul.f32 %v804_v61, %v3343_v59  ;;  %vm980_vm14 = vc.u32 %v3426_v24, %v3415_v43  ;;  %v1027_v39 = vand.u32 2147483647, %v3363_v23 }
  0x8c   :  { %v665_v11 = vand.u32 2147483647, %v664_v48  ;;  %v982_v13 = vsel %vm980_vm14, %v981_v10, %v3416_v20  ;;  %v1031_v16 = vshrl.u32 %v1030_v15, 23  ;;  %v678_v12 = vadd.s32 3, %v3392_v2 }
  0x8d   :  { %v694_v14 = vcombine.low %v690_v55, %v690_v55  ;;  %699 = vst [vmem:[%s4297_s2 + $0x28] sm:$0xf0] %v690_v55  ;;  %916 = vst [vmem:[%s4297_s2 + $0x40] sm:$0xf] %v908_v53  ;;  %v912_v49 = vcombine.high %v908_v53, %v908_v53  ;;  %v983_v50 = vadd.s32 %v982_v13, %v978_v40  ;;  %v3455_v44 = vmul.f32 16.0, %v2941_v0 }
  0x8e   :  { %v668_v7 = vmul.f32 %v667_v6, %v665_v11  ;;  %v2731_v33 = vadd.s32 4294967169, %v1031_v16  ;;  %v3463_v4 = vand.u32 3, %v678_v12  ;;  %v3466_v28 = vand.u32 3, %v3392_v2 }
  0x8f   :  { %698 = vst [vmem:[%s4297_s2 + $0x20] sm:$0xf0] %v694_v14  ;;  %917 = vst [vmem:[%s4297_s2 + $0x48] sm:$0xf] %v912_v49  ;;  %v984_v15 = vadd.s32 536870912, %v983_v50  ;;  %v1368_v46 = vand.u32 2139095040, %v3455_v44  ;;  %v3485_v17 = vadd.s32 %v3415_v43, %v3426_v24  ;;  %vm677_vm8 = vweird.f32 %v3043_v57 }
  0x90   :  { %v669_v51 = vxor.u32 2147483648, %v668_v7  ;;  %v1037_v52 = vadd.s32 1, %v2731_v33  ;;  %v1034_v9 = vand.u32 8388607, %v1027_v39  ;;  %v1365_v41 = vand.u32 2147483647, %v3455_v44 }
  0x91   :  { %v985_v42 = vshrl.u32 %v984_v15, 30  ;;  %vm3479_vm3 = vcmp.le.f32.partialorder %v923_v35, 0.7853982  ;;  %vm903_vm15 = vcmp.eq.s32.totalorder %v3466_v28, 2  ;;  %v1369_v31 = vshrl.u32 %v1368_v46, 23 }
  0x92   :  { %v670_v54 = vsel %vm587_vm2, %v669_v51, %v668_v7  ;;  %vm1038_vm0 = vcmp.gt.s32.totalorder %v1037_v52, 0  ;;  %vm925_vm2 = vcmp.lt.s32.totalorder %v3077_v37, 0  ;;  %v1035_v60 = vor.u32 8388608, %v1034_v9 }
  0x93   :  { %v673_v25 = vsel %vm3347_vm1, %v3043_v57, %v670_v54  ;;  %v986_v8 = vshll.u32 %v985_v42, 30  ;;  %v1039_v58 = vsel %vm1038_vm0, %v1037_v52, 0  ;;  %v1009_v63 = vsub.s32 4, %v985_v42 }
  0x94   :  { %2863 = vcosq.f32 %v673_v25  ;;  %v1041_v20 = vand.u32 31, %v1039_v58  ;;  %vm684_vm1 = vcmp.eq.s32.totalorder %v3463_v4, 2  ;;  %v3491_v35 = vshrl.u32 %v1039_v58, 5 }
  0x95   :  { %2865 = vsinq.f32 %v673_v25  ;;  %v3487_v27 = vsub.s32 %v983_v50, %v986_v8  ;;  %v3495_v19 = vand.u32 8388607, %v1365_v41  ;;  %vm681_vm4 = vcmp.eq.s32.totalorder %v3463_v4, 0 }
  0x96   :  { %v1042_v3 = vsub.s32 32, %v1041_v20  ;;  %vm900_vm5 = vcmp.eq.s32.totalorder %v3466_v28, 0  ;;  %v1044_v56 = vshll.u32 %v2914_v30, %v1041_v20  ;;  %v1047_v5 = vshll.u32 %v2915_v32, %v1041_v20 }
  0x97   :  { %v989_v43 = vsub.s32 0, %v3487_v27  ;;  %v1050_v24 = vshll.u32 %v2916_v34, %v1041_v20  ;;  %vm680_vm6 = vcmp.lt.s32.totalorder %v3463_v4, 2  ;;  %vm899_vm7 = vcmp.lt.s32.totalorder %v3466_v28, 2 }
  0x98   :  { %v1045_v62 = vshrl.u32 %v2915_v32, %v1042_v3  ;;  %v1048_v29 = vshrl.u32 %v2916_v34, %v1042_v3  ;;  %v1051_v26 = vshrl.u32 %v2917_v36, %v1042_v3  ;;  %v1053_v18 = vshll.u32 %v2917_v36, %v1041_v20 }
  0x99   :  { %v2728_v22 = vmin.u32 %v989_v43, %v3487_v27  ;;  %v1010_v21 = vsel %vm925_vm2, %v1009_v63, %v985_v42  ;;  %v1054_v40 = vshrl.u32 %v2918_v38, %v1042_v3  ;;  %v1056_v10 = vshll.u32 %v2918_v38, %v1041_v20 }
  0x9a   :  { %v1043_v47 = vshrl.u32 %v2914_v30, %v1042_v3  ;;  %v1057_v48 = vshrl.u32 %v2919_v45, %v1042_v3  ;;  %v3517_v6 = vshll.u32 %v1035_v60, 8  ;;  %v1373_v61 = vor.u32 8388608, %v3495_v19 }
  0x9b   :  { %v991_v55 = vclz %v2728_v22  ;;  %v1046_v53 = vor.u32 %v1045_v62, %v1044_v56  ;;  %v1049_v11 = vor.u32 %v1048_v29, %v1047_v5  ;;  %v1052_v13 = vor.u32 %v1051_v26, %v1050_v24 }
  0x9c   :  { %v3522_v16 = vsel %vm3479_vm3, 0, %v1010_v21  ;;  %v1055_v14 = vor.u32 %v1054_v40, %v1053_v18  ;;  %vm1059_vm9 = vcmp.lt.s32.totalorder %v3491_v35, 1  ;;  %v2744_v12 = vadd.s32 4294967169, %v1369_v31 }
  0x9d   :  { %v2729_v49 = vadd.s32 4294967294, %v991_v55  ;;  %v1058_v50 = vor.u32 %v1057_v48, %v1056_v10  ;;  %vm1061_vm10 = vcmp.lt.s32.totalorder %v3491_v35, 3  ;;  %vm1062_vm11 = vcmp.lt.s32.totalorder %v3491_v35, 4 }
  0x9e   :  { %v2864_v7 = vpop.eup %2863  ;;  %vm1060_vm12 = vcmp.lt.s32.totalorder %v3491_v35, 2  ;;  %v1063_v33 = vsel %vm1059_vm9, %v1043_v47, %v1046_v53  ;;  %v1064_v15 = vsel %vm1062_vm11, %v1052_v13, 2102212464  ;;  %v1068_v51 = vsel %vm1062_vm11, %v1055_v14, 920167782 }
  0x9f   :  { %v2866_v52 = vpop.eup %2865  ;;  %v685_v42 = vxor.u32 2147483648, %v2864_v7  ;;  %vm2730_vm13 = vcmp.lt.s32.totalorder %v2729_v49, 0  ;;  %v1067_v9 = vsel %vm1059_vm9, %v1046_v53, %v1049_v11  ;;  %v1071_v54 = vsel %vm1059_vm9, %v1049_v11, %v1052_v13 }
  0xa0   :  { %v682_v46 = vxor.u32 2147483648, %v2866_v52  ;;  %v994_v25 = vsel %vm2730_vm13, 0, %v2729_v49  ;;  %v1065_v8 = vsel %vm1061_vm10, %v1049_v11, %v1064_v15  ;;  %v1069_v58 = vsel %vm1061_vm10, %v1052_v13, %v1068_v51 }
  0xa1   :  { %v686_v20 = vsel %vm684_vm1, %v685_v42, %v2866_v52  ;;  %v905_v63 = vsel %vm903_vm15, %v685_v42, %v2866_v52  ;;  %v995_v60 = vsub.s32 32, %v994_v25  ;;  %v996_v3 = vshll.u32 %v3487_v27, %v994_v25 }
  0xa2   :  { %v683_v31 = vsel %vm681_vm4, %v2864_v7, %v682_v46  ;;  %v902_v43 = vsel %vm900_vm5, %v2864_v7, %v682_v46  ;;  %v999_v56 = vsub.s32 4294967266, %v994_v25  ;;  %v1072_v5 = vsel %vm1062_vm11, %v1058_v50, 1326507024 }
  0xa3   :  { %v687_v24 = vsel %vm680_vm6, %v683_v31, %v686_v20  ;;  %v906_v62 = vsel %vm899_vm7, %v902_v43, %v905_v63  ;;  %v997_v29 = vshrl.u32 %v3485_v17, %v995_v60  ;;  %v1073_v27 = vsel %vm1061_vm10, %v1055_v14, %v1072_v5 }
  0xa4   :  { %v688_v26 = vsel %vm677_vm8, nan, %v687_v24  ;;  %v907_v18 = vsel %vm677_vm8, nan, %v906_v62  ;;  %v1000_v22 = vadd.s32 127, %v999_v56  ;;  %v1074_v21 = vsel %vm1060_vm12, %v1071_v54, %v1073_v27 }
  0xa5   :  { %v691_v4 = vmul.f32 %v3343_v59, %v688_v26  ;;  %v909_v28 = vmul.f32 %v907_v18, %v3343_v59  ;;  %v998_v40 = vor.u32 %v997_v29, %v996_v3  ;;  %v1070_v17 = vsel %vm1060_vm12, %v1067_v9, %v1069_v58 }
  0xa6   :  { %v1001_v10 = vshll.u32 %v1000_v22, 23  ;;  %v1016_v47 = vadd.s32 3, %v3522_v16  ;;  %v3566_v48 = vmul.u32.u64.low %v3517_v6, %v1074_v21  ;;  %v3567_v55 = vmul.u32.u64.high %v3517_v6, %v1074_v21, %v3566_v48 }
  0xa7   :  { %v695_v57 = vcombine.low %v691_v4, %v691_v4  ;;  %701 = vst [vmem:[%s4297_s2 + $0x38] sm:$0xf0] %v691_v4  ;;  %918 = vst [vmem:[%s4297_s2 + $0x50] sm:$0xf] %v909_v28  ;;  %v913_v59 = vcombine.high %v909_v28, %v909_v28  ;;  %v1066_v53 = vsel %vm1060_vm12, %v1063_v33, %v1065_v8  ;;  %v1375_v11 = vadd.s32 1, %v2744_v12 }
  0xa8   :  { %v1002_v13 = vor.u32 4788187, %v1001_v10  ;;  %v1005_v14 = vcvt.s32.f32 %v998_v40  ;;  %v3578_v49 = vmul.u32.u64.low %v3517_v6, %v1070_v17  ;;  %v3579_v50 = vmul.u32.u64.high %v3517_v6, %v1070_v17, %v3578_v49 }
  0xa9   :  { %700 = vst [vmem:[%s4297_s2 + $0x30] sm:$0xf0] %v695_v57  ;;  %919 = vst [vmem:[%s4297_s2 + $0x58] sm:$0xf] %v913_v59  ;;  %vm1376_vm14 = vcmp.gt.s32.totalorder %v1375_v11, 0  ;;  %v3589_v12 = vmul.f32 16.0, %v2946_v1  ;;  %v1082_v33 = vmul.u32 %v3517_v6, %v1066_v53 }
  0xaa   :  { %v1003_v7 = vand.u32 2147483647, %v1002_v13  ;;  %v1377_v35 = vsel %vm1376_vm14, %v1375_v11, 0  ;;  %vm1084_vm0 = vc.u32 %v3567_v55, %v3578_v49  ;;  %v3596_v51 = vshll.u32 %v1373_v61, 8 }
  0xab   :  { %v1379_v15 = vand.u32 31, %v1377_v35  ;;  %v3598_v42 = vand.u32 3, %v1016_v47  ;;  %v1085_v9 = vadd.s32 1, %v3579_v50  ;;  %v1378_v54 = vshrl.u32 %v1377_v35, 5 }
  0xac   :  { %v1006_v52 = vmul.f32 %v1005_v14, %v1003_v7  ;;  %v1472_v28 = vand.u32 2139095040, %v3589_v12  ;;  %v3625_v11 = vstv %s3607_s28  ;;  %v1237_v14 = vand.u32 3, %v3522_v16 }
  0xad   :  { %v1380_v46 = vsub.s32 32, %v1379_v15  ;;  %v1382_v25 = vshll.u32 %v2914_v30, %v1379_v15  ;;  %v1385_v8 = vshll.u32 %v2915_v32, %v1379_v15  ;;  %v1388_v6 = vshll.u32 %v2916_v34, %v1379_v15 }
  0xae   :  { %v1007_v58 = vxor.u32 2147483648, %v1006_v52  ;;  %v1086_v20 = vsel %vm1084_vm0, %v1085_v9, %v3579_v50  ;;  %v1391_v19 = vshll.u32 %v2917_v36, %v1379_v15  ;;  %v1394_v61 = vshll.u32 %v2918_v38, %v1379_v15 }
  0xaf   :  { %v1087_v63 = vadd.s32 %v1086_v20, %v1082_v33  ;;  %v1381_v60 = vshrl.u32 %v2914_v30, %v1380_v46  ;;  %v1383_v3 = vshrl.u32 %v2915_v32, %v1380_v46  ;;  %v1386_v31 = vshrl.u32 %v2916_v34, %v1380_v46 }
  0xb0   :  { %v1008_v43 = vsel %vm925_vm2, %v1007_v58, %v1006_v52  ;;  %v1389_v56 = vshrl.u32 %v2917_v36, %v1380_v46  ;;  %v1392_v5 = vshrl.u32 %v2918_v38, %v1380_v46  ;;  %v1395_v24 = vshrl.u32 %v2919_v45, %v1380_v46 }
  0xb1   :  { %v1011_v62 = vsel %vm3479_vm3, %v3077_v37, %v1008_v43  ;;  %v1088_v29 = vadd.s32 536870912, %v1087_v63  ;;  %v1384_v27 = vor.u32 %v1383_v3, %v1382_v25  ;;  %v1387_v26 = vor.u32 %v1386_v31, %v1385_v8 }
  0xb2   :  { %2867 = vcosq.f32 %v1011_v62  ;;  %v1390_v18 = vor.u32 %v1389_v56, %v1388_v6  ;;  %v1393_v22 = vor.u32 %v1392_v5, %v1391_v19  ;;  %v1396_v21 = vor.u32 %v1395_v24, %v1394_v61 }
  0xb3   :  { %2869 = vsinq.f32 %v1011_v62  ;;  %v1089_v4 = vshrl.u32 %v1088_v29, 30  ;;  %vm1397_vm2 = vcmp.lt.s32.totalorder %v1378_v54, 1  ;;  %vm1398_vm1 = vcmp.lt.s32.totalorder %v1378_v54, 2 }
  0xb4   :  { %vm1399_vm15 = vcmp.lt.s32.totalorder %v1378_v54, 3  ;;  %vm1400_vm4 = vcmp.lt.s32.totalorder %v1378_v54, 4  ;;  %v1405_v40 = vsel %vm1397_vm2, %v1384_v27, %v1387_v26  ;;  %v1401_v2 = vsel %vm1397_vm2, %v1381_v60, %v1384_v27 }
  0xb5   :  { %v1090_v17 = vshll.u32 %v1089_v4, 30  ;;  %v1402_v10 = vsel %vm1400_vm4, %v1390_v18, 2102212464  ;;  %v1406_v47 = vsel %vm1400_vm4, %v1393_v22, 920167782  ;;  %v1409_v59 = vsel %vm1397_vm2, %v1387_v26, %v1390_v18 }
  0xb6   :  { %v1403_v48 = vsel %vm1399_vm15, %v1387_v26, %v1402_v10  ;;  %v1407_v57 = vsel %vm1399_vm15, %v1390_v18, %v1406_v47  ;;  %v1410_v53 = vsel %vm1400_vm4, %v1396_v21, 1326507024  ;;  %vm1015_vm3 = vweird.f32 %v3077_v37 }
  0xb7   :  { %v3627_v13 = vsub.s32 %v1087_v63, %v1090_v17  ;;  %v1408_v50 = vsel %vm1398_vm1, %v1405_v40, %v1407_v57  ;;  %vm1029_vm5 = vcmp.lt.s32.totalorder %v3363_v23, 0  ;;  %v1411_v7 = vsel %vm1399_vm15, %v1393_v22, %v1410_v53 }
  0xb8   :  { %v3634_v35 = vmul.u32.u64.low %v3596_v51, %v1408_v50  ;;  %v3635_v33 = vmul.u32.u64.high %v3596_v51, %v1408_v50, %v3634_v35  ;;  %v1404_v52 = vsel %vm1398_vm1, %v1401_v2, %v1403_v48  ;;  %v1412_v9 = vsel %vm1398_vm1, %v1409_v59, %v1411_v7 }
  0xb9   :  { %v1093_v15 = vsub.s32 0, %v3627_v13  ;;  %v1469_v46 = vand.u32 2147483647, %v3589_v12  ;;  %vm1018_vm6 = vcmp.lt.s32.totalorder %v3598_v42, 2  ;;  %v1473_v8 = vshrl.u32 %v1472_v28, 23 }
  0xba   :  { %v3644_v16 = vmul.u32.u64.low %v3596_v51, %v1412_v9  ;;  %v3645_v25 = vmul.u32.u64.high %v3596_v51, %v1412_v9, %v3644_v16  ;;  %vm1019_vm7 = vcmp.eq.s32.totalorder %v3598_v42, 0  ;;  %vm1022_vm8 = vcmp.eq.s32.totalorder %v3598_v42, 2 }
  0xbb   :  { %vm3651_vm9 = vcmp.le.f32.partialorder %v1027_v39, 0.7853982  ;;  %v2732_v54 = vmin.u32 %v1093_v15, %v3627_v13  ;;  %vm1238_vm10 = vcmp.lt.s32.totalorder %v1237_v14, 2  ;;  %vm1242_vm11 = vcmp.eq.s32.totalorder %v1237_v14, 2 }
  0xbc   :  { %v2868_v58 = vpop.eup %2867  ;;  %v1420_v20 = vmul.u32 %v3596_v51, %v1404_v52  ;;  %v1423_v19 = vadd.s32 1, %v3635_v33  ;;  %v2748_v61 = vadd.s32 4294967169, %v1473_v8  ;;  %v1113_v31 = vsub.s32 4, %v1089_v4 }
  0xbd   :  { %v2870_v63 = vpop.eup %2869  ;;  %v1023_v60 = vxor.u32 2147483648, %v2868_v58  ;;  %v1095_v3 = vclz %v2732_v54  ;;  %vm1239_vm12 = vcmp.eq.s32.totalorder %v1237_v14, 0  ;;  %v1083_v39 = vadd.s32 %v3578_v49, %v3567_v55 }
  0xbe   :  { %v1020_v43 = vxor.u32 2147483648, %v2870_v63  ;;  %vm1422_vm13 = vc.u32 %v3645_v25, %v3634_v35  ;;  %v1476_v56 = vand.u32 8388607, %v1469_v46  ;;  %v1479_v55 = vadd.s32 1, %v2748_v61 }
  0xbf   :  { %v1024_v51 = vsel %vm1022_vm8, %v1023_v60, %v2870_v63  ;;  %v2733_v5 = vadd.s32 4294967294, %v1095_v3  ;;  %v1244_v24 = vsel %vm1242_vm11, %v1023_v60, %v2870_v63  ;;  %v1424_v62 = vsel %vm1422_vm13, %v1423_v19, %v3635_v33 }
  0xc0   :  { %v1021_v29 = vsel %vm1019_vm7, %v2868_v58, %v1020_v43  ;;  %v1241_v27 = vsel %vm1239_vm12, %v2868_v58, %v1020_v43  ;;  %v1425_v26 = vadd.s32 %v1424_v62, %v1420_v20  ;;  %v1114_v18 = vsel %vm1029_vm5, %v1113_v31, %v1089_v4 }
  0xc1   :  { %v1025_v49 = vsel %vm1018_vm6, %v1021_v29, %v1024_v51  ;;  %vm2734_vm14 = vcmp.lt.s32.totalorder %v2733_v5, 0  ;;  %v1245_v22 = vsel %vm1238_vm10, %v1241_v27, %v1244_v24  ;;  %v1116_v48 = vsel %vm3651_vm9, 0, %v1114_v18 }
  0xc2   :  { %v1026_v21 = vsel %vm1015_vm3, nan, %v1025_v49  ;;  %v1098_v28 = vsel %vm2734_vm14, 0, %v2733_v5  ;;  %v1246_v40 = vsel %vm1015_vm3, nan, %v1245_v22  ;;  %v1426_v17 = vadd.s32 536870912, %v1425_v26 }
  0xc3   :  { %v1132_v2 = vmul.f32 %v3625_v11, %v1026_v21  ;;  %v1099_v10 = vsub.s32 32, %v1098_v28  ;;  %v1100_v42 = vshll.u32 %v3627_v13, %v1098_v28  ;;  %v1103_v47 = vsub.s32 4294967266, %v1098_v28 }
  0xc4   :  { %v1350_v4 = vmul.f32 %v1246_v40, %v3625_v11  ;;  %v1427_v57 = vshrl.u32 %v1426_v17, 30  ;;  %vm1480_vm0 = vcmp.gt.s32.totalorder %v1479_v55, 0  ;;  %v3693_v52 = vadd.s32 3, %v1116_v48 }
  0xc5   :  { %v1136_v59 = vcombine.low %v1132_v2, %v1132_v2  ;;  %1141 = vst [vmem:[%s4297_s2 + $0x48] sm:$0xf0] %v1132_v2  ;;  %v1101_v37 = vshrl.u32 %v1083_v39, %v1099_v10  ;;  %v1104_v53 = vadd.s32 127, %v1103_v47  ;;  %v1481_v14 = vsel %vm1480_vm0, %v1479_v55, 0 }
  0xc6   :  { %1358 = vst [vmem:[%s4297_s2 + $0x60] sm:$0xf] %v1350_v4  ;;  %v1354_v13 = vcombine.high %v1350_v4, %v1350_v4  ;;  %v1428_v50 = vshll.u32 %v1427_v57, 30  ;;  %v1483_v15 = vand.u32 31, %v1481_v14  ;;  %vm1367_vm2 = vcmp.lt.s32.totalorder %v3455_v44, 0 }
  0xc7   :  { %1140 = vst [vmem:[%s4297_s2 + $0x40] sm:$0xf0] %v1136_v59  ;;  %v1102_v7 = vor.u32 %v1101_v37, %v1100_v42  ;;  %v1105_v33 = vshll.u32 %v1104_v53, 23  ;;  %v1477_v16 = vor.u32 8388608, %v1476_v56  ;;  %v1451_v58 = vsub.s32 4, %v1427_v57 }
  0xc8   :  { %1359 = vst [vmem:[%s4297_s2 + $0x68] sm:$0xf] %v1354_v13  ;;  %v3699_v9 = vsub.s32 %v1425_v26, %v1428_v50  ;;  %v1484_v20 = vsub.s32 32, %v1483_v15  ;;  %v3701_v19 = vand.u32 3, %v1116_v48  ;;  %v1482_v63 = vshrl.u32 %v1481_v14, 5 }
  0xc9   :  { %v1106_v8 = vor.u32 4788187, %v1105_v33  ;;  %v1109_v54 = vcvt.s32.f32 %v1102_v7  ;;  %v1486_v60 = vshll.u32 %v2914_v30, %v1483_v15  ;;  %v1489_v43 = vshll.u32 %v2915_v32, %v1483_v15 }
  0xca   :  { %v1431_v61 = vsub.s32 0, %v3699_v9  ;;  %v1487_v31 = vshrl.u32 %v2915_v32, %v1484_v20  ;;  %v1490_v39 = vshrl.u32 %v2916_v34, %v1484_v20  ;;  %v1421_v56 = vadd.s32 %v3634_v35, %v3645_v25 }
  0xcb   :  { %v1107_v3 = vand.u32 2147483647, %v1106_v8  ;;  %v1492_v5 = vshll.u32 %v2916_v34, %v1483_v15  ;;  %v1493_v24 = vshrl.u32 %v2917_v36, %v1484_v20  ;;  %v1452_v29 = vsel %vm1367_vm2, %v1451_v58, %v1427_v57 }
  0xcc   :  { %v2745_v51 = vmin.u32 %v1431_v61, %v3699_v9  ;;  %v1495_v27 = vshll.u32 %v2917_v36, %v1483_v15  ;;  %v3716_v26 = vshll.u32 %v1477_v16, 8  ;;  %vm3720_vm1 = vcmp.le.f32.partialorder %v1365_v41, 0.7853982 }
  0xcd   :  { %v1110_v62 = vmul.f32 %v1109_v54, %v1107_v3  ;;  %v1485_v25 = vshrl.u32 %v2914_v30, %v1484_v20  ;;  %v1488_v49 = vor.u32 %v1487_v31, %v1486_v60  ;;  %vm1501_vm15 = vcmp.lt.s32.totalorder %v1482_v63, 1 }
  0xce   :  { %v1433_v35 = vclz %v2745_v51  ;;  %v1491_v22 = vor.u32 %v1490_v39, %v1489_v43  ;;  %v1496_v21 = vshrl.u32 %v2918_v38, %v1484_v20  ;;  %v1498_v28 = vshll.u32 %v2918_v38, %v1483_v15 }
  0xcf   :  { %v1111_v18 = vxor.u32 2147483648, %v1110_v62  ;;  %v1494_v17 = vor.u32 %v1493_v24, %v1492_v5  ;;  %v1499_v2 = vshrl.u32 %v2919_v45, %v1484_v20  ;;  %vm1502_vm4 = vcmp.lt.s32.totalorder %v1482_v63, 2 }
  0xd0   :  { %v2746_v40 = vadd.s32 4294967294, %v1433_v35  ;;  %v1497_v10 = vor.u32 %v1496_v21, %v1495_v27  ;;  %vm1503_vm3 = vcmp.lt.s32.totalorder %v1482_v63, 3  ;;  %vm1504_vm6 = vcmp.lt.s32.totalorder %v1482_v63, 4 }
  0xd1   :  { %v1112_v41 = vsel %vm1029_vm5, %v1111_v18, %v1110_v62  ;;  %v1500_v47 = vor.u32 %v1499_v2, %v1498_v28  ;;  %v1506_v48 = vsel %vm1504_vm6, %v1494_v17, 2102212464  ;;  %v1505_v57 = vsel %vm1501_vm15, %v1485_v25, %v1488_v49 }
  0xd2   :  { %v1115_v42 = vsel %vm3651_vm9, %v3363_v23, %v1112_v41  ;;  %vm2747_vm7 = vcmp.lt.s32.totalorder %v2746_v40, 0  ;;  %v1509_v59 = vsel %vm1501_vm15, %v1488_v49, %v1491_v22  ;;  %v1507_v13 = vsel %vm1503_vm3, %v1491_v22, %v1506_v48 }
  0xd3   :  { %2871 = vcosq.f32 %v1115_v42  ;;  %v1436_v4 = vsel %vm2747_vm7, 0, %v2746_v40  ;;  %v1510_v6 = vsel %vm1504_vm6, %v1497_v10, 920167782  ;;  %v1513_v50 = vsel %vm1501_vm15, %v1491_v22, %v1494_v17 }
  0xd4   :  { %2873 = vsinq.f32 %v1115_v42  ;;  %v1437_v37 = vsub.s32 32, %v1436_v4  ;;  %v1438_v53 = vshll.u32 %v3699_v9, %v1436_v4  ;;  %v1441_v14 = vsub.s32 4294967266, %v1436_v4 }
  0xd5   :  { %v1514_v7 = vsel %vm1504_vm6, %v1500_v47, 1326507024  ;;  %v1511_v16 = vsel %vm1503_vm3, %v1494_v17, %v1510_v6  ;;  %v1454_v54 = vsel %vm3720_vm1, 0, %v1452_v29  ;;  %v3748_v20 = vmul.f32 32.0, %v2941_v0 }
  0xd6   :  { %v1439_v33 = vshrl.u32 %v1421_v56, %v1437_v37  ;;  %v1442_v15 = vadd.s32 127, %v1441_v14  ;;  %v1515_v8 = vsel %vm1503_vm3, %v1497_v10, %v1514_v7  ;;  %v1512_v9 = vsel %vm1502_vm4, %v1509_v59, %v1511_v16 }
  0xd7   :  { %v1516_v58 = vsel %vm1502_vm4, %v1513_v50, %v1515_v8  ;;  %v1121_v43 = vand.u32 3, %v3693_v52  ;;  %v1508_v39 = vsel %vm1502_vm4, %v1505_v57, %v1507_v13  ;;  %vm1119_vm5 = vweird.f32 %v3363_v23 }
  0xd8   :  { %v1440_v61 = vor.u32 %v1439_v33, %v1438_v53  ;;  %v1443_v60 = vshll.u32 %v1442_v15, 23  ;;  %v3751_v3 = vmul.u32.u64.low %v3716_v26, %v1516_v58  ;;  %v3752_v31 = vmul.u32.u64.high %v3716_v26, %v1516_v58, %v3751_v3 }
  0xd9   :  { %v3757_v56 = vmul.u32.u64.low %v3716_v26, %v1512_v9  ;;  %v3758_v51 = vmul.u32.u64.high %v3716_v26, %v1512_v9, %v3757_v56  ;;  %vm1341_vm8 = vcmp.lt.s32.totalorder %v3701_v19, 2  ;;  %vm1342_vm9 = vcmp.eq.s32.totalorder %v3701_v19, 0 }
  0xda   :  { %v1444_v5 = vor.u32 4788187, %v1443_v60  ;;  %v1447_v24 = vcvt.s32.f32 %v1440_v61  ;;  %v1458_v62 = vadd.s32 3, %v1454_v54  ;;  %v1810_v29 = vand.u32 2139095040, %v3748_v20 }
  0xdb   :  { %vm1345_vm10 = vcmp.eq.s32.totalorder %v3701_v19, 2  ;;  %v1524_v63 = vmul.u32 %v3716_v26, %v1508_v39  ;;  %vm1526_vm11 = vc.u32 %v3752_v31, %v3757_v56  ;;  %vm1122_vm12 = vcmp.lt.s32.totalorder %v1121_v43, 2 }
  0xdc   :  { %v1445_v52 = vand.u32 2147483647, %v1444_v5  ;;  %vm1126_vm13 = vcmp.eq.s32.totalorder %v1121_v43, 2  ;;  %v1527_v35 = vadd.s32 1, %v3758_v51  ;;  %v1811_v25 = vshrl.u32 %v1810_v29, 23 }
  0xdd   :  { %v2872_v27 = vpop.eup %2871  ;;  %vm1123_vm14 = vcmp.eq.s32.totalorder %v1121_v43, 0  ;;  %v1807_v21 = vand.u32 2147483647, %v3748_v20  ;;  %v3773_v40 = vand.u32 3, %v1458_v62  ;;  %v3780_v4 = vand.u32 3, %v1454_v54 }
  0xde   :  { %v2874_v49 = vpop.eup %2873  ;;  %v1127_v18 = vxor.u32 2147483648, %v2872_v27  ;;  %v1448_v22 = vmul.f32 %v1447_v24, %v1445_v52  ;;  %v1528_v26 = vsel %vm1526_vm11, %v1527_v35, %v3758_v51  ;;  %v2761_v17 = vadd.s32 4294967169, %v1811_v25 }
  0xdf   :  { %v1124_v28 = vxor.u32 2147483648, %v2874_v49  ;;  %v1529_v42 = vadd.s32 %v1528_v26, %v1524_v63  ;;  %v1814_v15 = vand.u32 8388607, %v1807_v21  ;;  %v3801_v23 = vmul.f32 32.0, %v2946_v1 }
  0xe0   :  { %v1128_v2 = vsel %vm1126_vm13, %v1127_v18, %v2874_v49  ;;  %v1347_v41 = vsel %vm1345_vm10, %v1127_v18, %v2874_v49  ;;  %v1449_v10 = vxor.u32 2147483648, %v1448_v22  ;;  %v1817_v57 = vadd.s32 1, %v2761_v17 }
  0xe1   :  { %v1125_v47 = vsel %vm1123_vm14, %v2872_v27, %v1124_v28  ;;  %v1344_v48 = vsel %vm1342_vm9, %v2872_v27, %v1124_v28  ;;  %v1530_v14 = vadd.s32 536870912, %v1529_v42  ;;  %v3811_v54 = vstv %s3771_s9 }
  0xe2   :  { %v1129_v59 = vsel %vm1122_vm12, %v1125_v47, %v1128_v2  ;;  %v1348_v37 = vsel %vm1341_vm8, %v1344_v48, %v1347_v41  ;;  %v1450_v53 = vsel %vm1367_vm2, %v1449_v10, %v1448_v22  ;;  %vm1818_vm0 = vcmp.gt.s32.totalorder %v1817_v57, 0 }
  0xe3   :  { %v1130_v13 = vsel %vm1119_vm5, nan, %v1129_v59  ;;  %v1349_v6 = vsel %vm1119_vm5, nan, %v1348_v37  ;;  %v1453_v50 = vsel %vm3720_vm1, %v3455_v44, %v1450_v53  ;;  %v3796_v33 = vshrl.u32 %v1530_v14, 30 }
  0xe4   :  { %v1133_v7 = vmul.f32 %v3625_v11, %v1130_v13  ;;  %v1351_v19 = vmul.f32 %v1349_v6, %v3625_v11  ;;  %2875 = vcosq.f32 %v1453_v50  ;;  %v1819_v16 = vsel %vm1818_vm0, %v1817_v57, 0 }
  0xe5   :  { %2877 = vsinq.f32 %v1453_v50  ;;  %v1532_v55 = vshll.u32 %v3796_v33, 30  ;;  %v1821_v9 = vand.u32 31, %v1819_v16  ;;  %vm1460_vm2 = vcmp.lt.s32.totalorder %v3773_v40, 2 }
  0xe6   :  { %v1137_v8 = vcombine.low %v1133_v7, %v1133_v7  ;;  %1143 = vst [vmem:[%s4297_s2 + $0x58] sm:$0xf0] %v1133_v7  ;;  %1360 = vst [vmem:[%s4297_s2 + $0x70] sm:$0xf] %v1351_v19  ;;  %v1355_v11 = vcombine.high %v1351_v19, %v1351_v19  ;;  %vm1461_vm1 = vcmp.eq.s32.totalorder %v3773_v40, 0  ;;  %vm1464_vm15 = vcmp.eq.s32.totalorder %v3773_v40, 2 }
  0xe7   :  { %v3822_v58 = vsub.s32 %v1529_v42, %v1532_v55  ;;  %vm1680_vm4 = vcmp.lt.s32.totalorder %v3780_v4, 2  ;;  %vm1457_vm3 = vweird.f32 %v3455_v44  ;;  %vm1681_vm6 = vcmp.eq.s32.totalorder %v3780_v4, 0 }
  0xe8   :  { %1142 = vst [vmem:[%s4297_s2 + $0x50] sm:$0xf0] %v1137_v8  ;;  %1361 = vst [vmem:[%s4297_s2 + $0x78] sm:$0xf] %v1355_v11  ;;  %v1815_v61 = vor.u32 8388608, %v1814_v15  ;;  %v1822_v60 = vsub.s32 32, %v1821_v9  ;;  %v1824_v39 = vshll.u32 %v2914_v30, %v1821_v9  ;;  %v1827_v51 = vshll.u32 %v2915_v32, %v1821_v9 }
  0xe9   :  { %v1914_v3 = vand.u32 2139095040, %v3801_v23  ;;  %v1535_v43 = vsub.s32 0, %v3822_v58  ;;  %v1830_v5 = vshll.u32 %v2916_v34, %v1821_v9  ;;  %vm1684_vm7 = vcmp.eq.s32.totalorder %v3780_v4, 2 }
  0xea   :  { %v1825_v24 = vshrl.u32 %v2915_v32, %v1822_v60  ;;  %v1828_v62 = vshrl.u32 %v2916_v34, %v1822_v60  ;;  %v1831_v29 = vshrl.u32 %v2917_v36, %v1822_v60  ;;  %v1525_v52 = vadd.s32 %v3757_v56, %v3752_v31 }
  0xeb   :  { %v2749_v63 = vmin.u32 %v1535_v43, %v3822_v58  ;;  %v3839_v27 = vshrl.u32 %v1819_v16, 5  ;;  %v1911_v35 = vand.u32 2147483647, %v3801_v23  ;;  %v1555_v25 = vsub.s32 4, %v3796_v33 }
  0xec   :  { %v1823_v49 = vshrl.u32 %v2914_v30, %v1822_v60  ;;  %v3844_v18 = vshll.u32 %v1815_v61, 8  ;;  %v1915_v22 = vshrl.u32 %v1914_v3, 23  ;;  %v1826_v17 = vor.u32 %v1825_v24, %v1824_v39 }
  0xed   :  { %v1537_v26 = vclz %v2749_v63  ;;  %v1829_v2 = vor.u32 %v1828_v62, %v1827_v51  ;;  %v1832_v41 = vor.u32 %v1831_v29, %v1830_v5  ;;  %vm1471_vm5 = vcmp.lt.s32.totalorder %v3589_v12, 0 }
  0xee   :  { %v2876_v28 = vpop.eup %2875  ;;  %v1833_v56 = vshll.u32 %v2917_v36, %v1821_v9  ;;  %v1834_v42 = vshrl.u32 %v2918_v38, %v1822_v60  ;;  %v1836_v47 = vshll.u32 %v2918_v38, %v1821_v9  ;;  %v1837_v59 = vshrl.u32 %v2919_v45, %v1822_v60 }
  0xef   :  { %v2878_v10 = vpop.eup %2877  ;;  %v1465_v31 = vxor.u32 2147483648, %v2876_v28  ;;  %v2750_v57 = vadd.s32 4294967294, %v1537_v26  ;;  %vm1839_vm8 = vcmp.lt.s32.totalorder %v3839_v27, 1  ;;  %vm1840_vm9 = vcmp.lt.s32.totalorder %v3839_v27, 2 }
  0xf0   :  { %v1462_v48 = vxor.u32 2147483648, %v2878_v10  ;;  %v1835_v14 = vor.u32 %v1834_v42, %v1833_v56  ;;  %v1838_v50 = vor.u32 %v1837_v59, %v1836_v47  ;;  %vm1841_vm11 = vcmp.lt.s32.totalorder %v3839_v27, 3 }
  0xf1   :  { %v1466_v37 = vsel %vm1464_vm15, %v1465_v31, %v2878_v10  ;;  %v1686_v53 = vsel %vm1684_vm7, %v1465_v31, %v2878_v10  ;;  %vm2751_vm10 = vcmp.lt.s32.totalorder %v2750_v57, 0  ;;  %vm1842_vm12 = vcmp.lt.s32.totalorder %v3839_v27, 4 }
  0xf2   :  { %v1463_v13 = vsel %vm1461_vm1, %v2876_v28, %v1462_v48  ;;  %v1683_v6 = vsel %vm1681_vm6, %v2876_v28, %v1462_v48  ;;  %v1540_v19 = vsel %vm2751_vm10, 0, %v2750_v57  ;;  %v1843_v40 = vsel %vm1839_vm8, %v1823_v49, %v1826_v17 }
  0xf3   :  { %v1467_v7 = vsel %vm1460_vm2, %v1463_v13, %v1466_v37  ;;  %v1687_v15 = vsel %vm1680_vm4, %v1683_v6, %v1686_v53  ;;  %v1541_v8 = vsub.s32 32, %v1540_v19  ;;  %v1542_v11 = vshll.u32 %v3822_v58, %v1540_v19 }
  0xf4   :  { %v1468_v16 = vsel %vm1457_vm3, nan, %v1467_v7  ;;  %v1545_v55 = vsub.s32 4294967266, %v1540_v19  ;;  %v1688_v61 = vsel %vm1457_vm3, nan, %v1687_v15  ;;  %v1844_v43 = vsel %vm1842_vm12, %v1832_v41, 2102212464 }
  0xf5   :  { %v1574_v9 = vmul.f32 %v3811_v54, %v1468_v16  ;;  %v1543_v4 = vshrl.u32 %v1525_v52, %v1541_v8  ;;  %v1792_v3 = vmul.f32 %v1688_v61, %v3811_v54  ;;  %v1845_v44 = vsel %vm1841_vm11, %v1829_v2, %v1844_v43 }
  0xf6   :  { %v1546_v60 = vadd.s32 127, %v1545_v55  ;;  %v1847_v58 = vsel %vm1839_vm8, %v1826_v17, %v1829_v2  ;;  %v1848_v51 = vsel %vm1842_vm12, %v1835_v14, 920167782  ;;  %v1556_v62 = vsel %vm1471_vm5, %v1555_v25, %v3796_v33 }
  0xf7   :  { %v1578_v39 = vcombine.low %v1574_v9, %v1574_v9  ;;  %1583 = vst [vmem:[%s4297_s2 + $0x68] sm:$0xf0] %v1574_v9  ;;  %v1544_v5 = vor.u32 %v1543_v4, %v1542_v11  ;;  %1800 = vst [vmem:[%s4297_s2 + $0x80] sm:$0xf] %v1792_v3  ;;  %v1796_v29 = vcombine.high %v1792_v3, %v1792_v3  ;;  %v1852_v33 = vsel %vm1842_vm12, %v1838_v50, 1326507024 }
  0xf8   :  { %v1547_v24 = vshll.u32 %v1546_v60, 23  ;;  %v1846_v52 = vsel %vm1840_vm9, %v1843_v40, %v1845_v44  ;;  %v1849_v63 = vsel %vm1841_vm11, %v1832_v41, %v1848_v51  ;;  %v1851_v49 = vsel %vm1839_vm8, %v1829_v2, %v1832_v41 }
  0xf9   :  { %1582 = vst [vmem:[%s4297_s2 + $0x60] sm:$0xf0] %v1578_v39  ;;  %v1551_v28 = vcvt.s32.f32 %v1544_v5  ;;  %1801 = vst [vmem:[%s4297_s2 + $0x88] sm:$0xf] %v1796_v29  ;;  %v1850_v26 = vsel %vm1840_vm9, %v1847_v58, %v1849_v63  ;;  %v1853_v17 = vsel %vm1841_vm11, %v1835_v14, %v1852_v33  ;;  %v2765_v31 = vadd.s32 4294967169, %v1915_v22 }
  0xfa   :  { %v1548_v25 = vor.u32 4788187, %v1547_v24  ;;  %v1854_v10 = vsel %vm1840_vm9, %v1851_v49, %v1853_v17  ;;  %v3914_v2 = vmul.u32.u64.low %v3844_v18, %v1850_v26  ;;  %v3915_v41 = vmul.u32.u64.high %v3844_v18, %v1850_v26, %v3914_v2 }
  0xfb   :  { %v3919_v42 = vmul.u32.u64.low %v3844_v18, %v1854_v10  ;;  %v3920_v47 = vmul.u32.u64.high %v3844_v18, %v1854_v10, %v3919_v42  ;;  %vm3924_vm13 = vcmp.le.f32.partialorder %v1469_v46, 0.7853982  ;;  %v1918_v27 = vand.u32 8388607, %v1911_v35 }
  0xfc   :  { %v1549_v56 = vand.u32 2147483647, %v1548_v25  ;;  %v1921_v57 = vadd.s32 1, %v2765_v31  ;;  %v1558_v37 = vsel %vm3924_vm13, 0, %v1556_v62  ;;  %v1862_v22 = vmul.u32 %v3844_v18, %v1846_v52 }
  0xfd   :  { %v1865_v53 = vadd.s32 1, %v3915_v41  ;;  %vm1864_vm0 = vc.u32 %v3920_v47, %v3914_v2  ;;  %v3937_v13 = vmul.f32 64.0, %v2941_v0  ;;  %v1562_v6 = vadd.s32 3, %v1558_v37 }
  0xfe   :  { %v1552_v59 = vmul.f32 %v1551_v28, %v1549_v56  ;;  %vm1922_vm14 = vcmp.gt.s32.totalorder %v1921_v57, 0  ;;  %v1919_v7 = vor.u32 8388608, %v1918_v27  ;;  %v3942_v18 = vand.u32 3, %v1558_v37 }
  0xff   :  { %v1923_v46 = vsel %vm1922_vm14, %v1921_v57, 0  ;;  %v1866_v50 = vsel %vm1864_vm0, %v1865_v53, %v3915_v41  ;;  %v1563_v60 = vand.u32 3, %v1562_v6  ;;  %vm1561_vm4 = vweird.f32 %v3589_v12 }
 0x100   :  { %v1553_v14 = vxor.u32 2147483648, %v1552_v59  ;;  %v1925_v19 = vand.u32 31, %v1923_v46  ;;  %v1867_v16 = vadd.s32 %v1866_v50, %v1862_v22  ;;  %v3944_v8 = vshrl.u32 %v1923_v46, 5 }
 0x101   :  { %vm1784_vm2 = vcmp.eq.s32.totalorder %v3942_v18, 0  ;;  %vm1783_vm1 = vcmp.lt.s32.totalorder %v3942_v18, 2  ;;  %v2252_v33 = vand.u32 2139095040, %v3937_v13  ;;  %vm1787_vm7 = vcmp.eq.s32.totalorder %v3942_v18, 2 }
 0x102   :  { %v1554_v15 = vsel %vm1471_vm5, %v1553_v14, %v1552_v59  ;;  %v1926_v55 = vsub.s32 32, %v1925_v19  ;;  %v1928_v0 = vshll.u32 %v2914_v30, %v1925_v19  ;;  %v1931_v9 = vshll.u32 %v2915_v32, %v1925_v19 }
 0x103   :  { %v1557_v11 = vsel %vm3924_vm13, %v3589_v12, %v1554_v15  ;;  %v1868_v61 = vadd.s32 536870912, %v1867_v16  ;;  %v1934_v40 = vshll.u32 %v2916_v34, %v1925_v19  ;;  %v1937_v4 = vshll.u32 %v2917_v36, %v1925_v19 }
 0x104   :  { %2879 = vcosq.f32 %v1557_v11  ;;  %v1929_v3 = vshrl.u32 %v2915_v32, %v1926_v55  ;;  %v1932_v43 = vshrl.u32 %v2916_v34, %v1926_v55  ;;  %v1935_v44 = vshrl.u32 %v2917_v36, %v1926_v55 }
 0x105   :  { %2881 = vsinq.f32 %v1557_v11  ;;  %v3955_v39 = vshrl.u32 %v1868_v61, 30  ;;  %v1938_v58 = vshrl.u32 %v2918_v38, %v1926_v55  ;;  %v1940_v51 = vshll.u32 %v2918_v38, %v1925_v19 }
 0x106   :  { %v1930_v5 = vor.u32 %v1929_v3, %v1928_v0  ;;  %v1933_v24 = vor.u32 %v1932_v43, %v1931_v9  ;;  %v1941_v62 = vshrl.u32 %v2919_v45, %v1926_v55  ;;  %v1936_v52 = vor.u32 %v1935_v44, %v1934_v40 }
 0x107   :  { %v1870_v29 = vshll.u32 %v3955_v39, 30  ;;  %v1939_v63 = vor.u32 %v1938_v58, %v1937_v4  ;;  %vm1943_vm15 = vcmp.lt.s32.totalorder %v3944_v8, 1  ;;  %vm1945_vm3 = vcmp.lt.s32.totalorder %v3944_v8, 3 }
 0x108   :  { %v1942_v49 = vor.u32 %v1941_v62, %v1940_v51  ;;  %vm1946_vm6 = vcmp.lt.s32.totalorder %v3944_v8, 4  ;;  %v1927_v28 = vshrl.u32 %v2914_v30, %v1926_v55  ;;  %vm1944_vm5 = vcmp.lt.s32.totalorder %v3944_v8, 2 }
 0x109   :  { %v3970_v25 = vsub.s32 %v1867_v16, %v1870_v29  ;;  %vm1564_vm8 = vcmp.lt.s32.totalorder %v1563_v60, 2  ;;  %v1951_v26 = vsel %vm1943_vm15, %v1930_v5, %v1933_v24  ;;  %v1952_v17 = vsel %vm1946_vm6, %v1939_v63, 920167782 }
 0x10a   :  { %v1959_v10 = vshll.u32 %v1919_v7, 8  ;;  %vm1565_vm9 = vcmp.eq.s32.totalorder %v1563_v60, 0  ;;  %v1948_v31 = vsel %vm1946_vm6, %v1936_v52, 2102212464  ;;  %v1953_v56 = vsel %vm1945_vm3, %v1936_v52, %v1952_v17 }
 0x10b   :  { %v1873_v41 = vsub.s32 0, %v3970_v25  ;;  %v1954_v42 = vsel %vm1944_vm5, %v1951_v26, %v1953_v56  ;;  %v1955_v48 = vsel %vm1943_vm15, %v1933_v24, %v1936_v52  ;;  %v1956_v27 = vsel %vm1946_vm6, %v1942_v49, 1326507024 }
 0x10c   :  { %v2253_v57 = vshrl.u32 %v2252_v33, 23  ;;  %vm1568_vm10 = vcmp.eq.s32.totalorder %v1563_v60, 2  ;;  %vm1809_vm11 = vcmp.lt.s32.totalorder %v3748_v20, 0  ;;  %v1947_v22 = vsel %vm1943_vm15, %v1927_v28, %v1930_v5 }
 0x10d   :  { %v2762_v37 = vmin.u32 %v1873_v41, %v3970_v25  ;;  %v1957_v53 = vsel %vm1945_vm3, %v1939_v63, %v1956_v27  ;;  %v1949_v6 = vsel %vm1945_vm3, %v1933_v24, %v1948_v31  ;;  %v1863_v15 = vadd.s32 %v3914_v2, %v3920_v47 }
 0x10e   :  { %v2880_v59 = vpop.eup %2879  ;;  %v3997_v50 = vmul.u32.u64.low %v1959_v10, %v1954_v42  ;;  %v3998_v7 = vmul.u32.u64.high %v1959_v10, %v1954_v42, %v3997_v50  ;;  %v1958_v11 = vsel %vm1944_vm5, %v1955_v48, %v1957_v53  ;;  %v1893_v9 = vsub.s32 4, %v3955_v39 }
 0x10f   :  { %v2882_v14 = vpop.eup %2881  ;;  %v1569_v46 = vxor.u32 2147483648, %v2880_v59  ;;  %v1875_v16 = vclz %v2762_v37  ;;  %v2778_v61 = vadd.s32 4294967169, %v2253_v57  ;;  %v1950_v2 = vsel %vm1944_vm5, %v1947_v22, %v1949_v6 }
 0x110   :  { %v1566_v19 = vxor.u32 2147483648, %v2882_v14  ;;  %v4016_v44 = vmul.u32.u64.low %v1959_v10, %v1958_v11  ;;  %v4017_v58 = vmul.u32.u64.high %v1959_v10, %v1958_v11, %v4016_v44  ;;  %v1969_v24 = vadd.s32 1, %v3998_v7 }
 0x111   :  { %v1570_v55 = vsel %vm1568_vm10, %v1569_v46, %v2882_v14  ;;  %v1789_v0 = vsel %vm1787_vm7, %v1569_v46, %v2882_v14  ;;  %v2763_v3 = vadd.s32 4294967294, %v1875_v16  ;;  %v1966_v62 = vmul.u32 %v1959_v10, %v1950_v2 }
 0x112   :  { %v1567_v40 = vsel %vm1565_vm9, %v2880_v59, %v1566_v19  ;;  %v1786_v4 = vsel %vm1784_vm2, %v2880_v59, %v1566_v19  ;;  %v2259_v49 = vadd.s32 1, %v2778_v61  ;;  %vm1968_vm13 = vc.u32 %v4017_v58, %v3997_v50 }
 0x113   :  { %v1571_v47 = vsel %vm1564_vm8, %v1567_v40, %v1570_v55  ;;  %v1790_v43 = vsel %vm1783_vm1, %v1786_v4, %v1789_v0  ;;  %vm2764_vm12 = vcmp.lt.s32.totalorder %v2763_v3, 0  ;;  %v1970_v26 = vsel %vm1968_vm13, %v1969_v24, %v3998_v7 }
 0x114   :  { %v1572_v51 = vsel %vm1561_vm4, nan, %v1571_v47  ;;  %v1791_v5 = vsel %vm1561_vm4, nan, %v1790_v43  ;;  %v1878_v18 = vsel %vm2764_vm12, 0, %v2763_v3  ;;  %vm2260_vm14 = vcmp.gt.s32.totalorder %v2259_v49, 0 }
 0x115   :  { %v1575_v8 = vmul.f32 %v3811_v54, %v1572_v51  ;;  %v1793_v60 = vmul.f32 %v1791_v5, %v3811_v54  ;;  %v1879_v29 = vsub.s32 32, %v1878_v18  ;;  %v1880_v52 = vshll.u32 %v3970_v25, %v1878_v18 }
 0x116   :  { %v1883_v63 = vsub.s32 4294967266, %v1878_v18  ;;  %v1894_v54 = vsel %vm1809_vm11, %v1893_v9, %v3955_v39  ;;  %v1971_v17 = vadd.s32 %v1970_v26, %v1966_v62  ;;  %v2249_v39 = vand.u32 2147483647, %v3937_v13 }
 0x117   :  { %v1579_v33 = vcombine.low %v1575_v8, %v1575_v8  ;;  %1585 = vst [vmem:[%s4297_s2 + $0x78] sm:$0xf0] %v1575_v8  ;;  %1802 = vst [vmem:[%s4297_s2 + $0x90] sm:$0xf] %v1793_v60  ;;  %v1797_v12 = vcombine.high %v1793_v60, %v1793_v60  ;;  %v1881_v25 = vshrl.u32 %v1863_v15, %v1879_v29  ;;  %v2261_v10 = vsel %vm2260_vm14, %v2259_v49, 0 }
 0x118   :  { %v1884_v28 = vadd.s32 127, %v1883_v63  ;;  %vm4050_vm0 = vcmp.le.f32.partialorder %v1807_v21, 0.7853982  ;;  %v2263_v42 = vand.u32 31, %v2261_v10  ;;  %v1972_v27 = vadd.s32 536870912, %v1971_v17 }
 0x119   :  { %1584 = vst [vmem:[%s4297_s2 + $0x70] sm:$0xf0] %v1579_v33  ;;  %1803 = vst [vmem:[%s4297_s2 + $0x98] sm:$0xf] %v1797_v12  ;;  %v1882_v31 = vor.u32 %v1881_v25, %v1880_v52  ;;  %v1896_v48 = vsel %vm4050_vm0, 0, %v1894_v54  ;;  %v4057_v22 = vstv %s4026_s24  ;;  %v4064_v14 = vmul.f32 64.0, %v2946_v1 }
 0x11a   :  { %v1885_v56 = vshll.u32 %v1884_v28, 23  ;;  %v2264_v37 = vsub.s32 32, %v2263_v42  ;;  %v4059_v53 = vshrl.u32 %v1972_v27, 30  ;;  %v2256_v21 = vand.u32 8388607, %v2249_v39 }
 0x11b   :  { %v1889_v59 = vcvt.s32.f32 %v1882_v31  ;;  %v1900_v6 = vadd.s32 3, %v1896_v48  ;;  %v2266_v7 = vshll.u32 %v2914_v30, %v2263_v42  ;;  %v2269_v19 = vshll.u32 %v2915_v32, %v2263_v42 }
 0x11c   :  { %v1886_v57 = vor.u32 4788187, %v1885_v56  ;;  %v1974_v15 = vshll.u32 %v4059_v53, 30  ;;  %v2267_v16 = vshrl.u32 %v2915_v32, %v2264_v37  ;;  %v2272_v11 = vshll.u32 %v2916_v34, %v2263_v42 }
 0x11d   :  { %v2275_v55 = vshll.u32 %v2917_v36, %v2263_v42  ;;  %v2270_v9 = vshrl.u32 %v2916_v34, %v2264_v37  ;;  %v2273_v1 = vshrl.u32 %v2917_v36, %v2264_v37  ;;  %v2276_v61 = vshrl.u32 %v2918_v38, %v2264_v37 }
 0x11e   :  { %v1887_v46 = vand.u32 2147483647, %v1886_v57  ;;  %v4075_v40 = vsub.s32 %v1971_v17, %v1974_v15  ;;  %v2257_v4 = vor.u32 8388608, %v2256_v21  ;;  %v2262_v3 = vshrl.u32 %v2261_v10, 5 }
 0x11f   :  { %v2353_v2 = vand.u32 2147483647, %v4064_v14  ;;  %v4078_v43 = vand.u32 3, %v1900_v6  ;;  %v2278_v44 = vshll.u32 %v2918_v38, %v2263_v42  ;;  %v2279_v51 = vshrl.u32 %v2919_v45, %v2264_v37 }
 0x120   :  { %v1890_v0 = vmul.f32 %v1889_v59, %v1887_v46  ;;  %v1977_v5 = vsub.s32 0, %v4075_v40  ;;  %v4083_v24 = vand.u32 3, %v1896_v48  ;;  %v2265_v8 = vshrl.u32 %v2914_v30, %v2264_v37 }
 0x121   :  { %v2268_v60 = vor.u32 %v2267_v16, %v2266_v7  ;;  %v2271_v62 = vor.u32 %v2270_v9, %v2269_v19  ;;  %v2274_v29 = vor.u32 %v2273_v1, %v2272_v11  ;;  %v2277_v52 = vor.u32 %v2276_v61, %v2275_v55 }
 0x122   :  { %v1891_v47 = vxor.u32 2147483648, %v1890_v0  ;;  %v2766_v49 = vmin.u32 %v1977_v5, %v4075_v40  ;;  %vm2281_vm2 = vcmp.lt.s32.totalorder %v2262_v3, 1  ;;  %vm2284_vm1 = vcmp.lt.s32.totalorder %v2262_v3, 4 }
 0x123   :  { %v2280_v33 = vor.u32 %v2279_v51, %v2278_v44  ;;  %vm2283_vm15 = vcmp.lt.s32.totalorder %v2262_v3, 3  ;;  %v2356_v12 = vand.u32 2139095040, %v4064_v14  ;;  %vm2282_vm4 = vcmp.lt.s32.totalorder %v2262_v3, 2 }
 0x124   :  { %v1892_v18 = vsel %vm1809_vm11, %v1891_v47, %v1890_v0  ;;  %v1979_v54 = vclz %v2766_v49  ;;  %v4093_v25 = vshll.u32 %v2257_v4, 8  ;;  %v1967_v28 = vadd.s32 %v3997_v50, %v4017_v58 }
 0x125   :  { %v1895_v63 = vsel %vm4050_vm0, %v3748_v20, %v1892_v18  ;;  %v2286_v26 = vsel %vm2284_vm1, %v2274_v29, 2102212464  ;;  %v2289_v17 = vsel %vm2281_vm2, %v2268_v60, %v2271_v62  ;;  %v2290_v10 = vsel %vm2284_vm1, %v2277_v52, 920167782 }
 0x126   :  { %2883 = vcosq.f32 %v1895_v63  ;;  %vm1903_vm3 = vcmp.eq.s32.totalorder %v4078_v43, 0  ;;  %vm1913_vm6 = vcmp.lt.s32.totalorder %v3801_v23, 0  ;;  %v2767_v41 = vadd.s32 4294967294, %v1979_v54 }
 0x127   :  { %2885 = vsinq.f32 %v1895_v63  ;;  %v2285_v31 = vsel %vm2281_vm2, %v2265_v8, %v2268_v60  ;;  %v2291_v56 = vsel %vm2283_vm15, %v2274_v29, %v2290_v10  ;;  %v2293_v42 = vsel %vm2281_vm2, %v2271_v62, %v2274_v29 }
 0x128   :  { %vm1902_vm7 = vcmp.lt.s32.totalorder %v4078_v43, 2  ;;  %v2287_v50 = vsel %vm2283_vm15, %v2271_v62, %v2286_v26  ;;  %v2292_v58 = vsel %vm2282_vm4, %v2289_v17, %v2291_v56  ;;  %v2294_v48 = vsel %vm2284_vm1, %v2280_v33, 1326507024 }
 0x129   :  { %v2357_v27 = vshrl.u32 %v2356_v12, 23  ;;  %vm1899_vm5 = vweird.f32 %v3748_v20  ;;  %vm2768_vm8 = vcmp.lt.s32.totalorder %v2767_v41, 0  ;;  %v2295_v57 = vsel %vm2283_vm15, %v2277_v52, %v2294_v48 }
 0x12a   :  { %v4112_v59 = vmul.u32.u64.low %v4093_v25, %v2292_v58  ;;  %v4113_v37 = vmul.u32.u64.high %v4093_v25, %v2292_v58, %v4112_v59  ;;  %vm1906_vm9 = vcmp.eq.s32.totalorder %v4078_v43, 2  ;;  %v1982_v21 = vsel %vm2768_vm8, 0, %v2767_v41 }
 0x12b   :  { %v2296_v46 = vsel %vm2282_vm4, %v2293_v42, %v2295_v57  ;;  %v2782_v6 = vadd.s32 4294967169, %v2357_v27  ;;  %vm4120_vm10 = vcmp.le.f32.partialorder %v1911_v35, 0.7853982  ;;  %v1983_v19 = vsub.s32 32, %v1982_v21 }
 0x12c   :  { %v1984_v15 = vshll.u32 %v4075_v40, %v1982_v21  ;;  %v1987_v16 = vsub.s32 4294967266, %v1982_v21  ;;  %v2288_v11 = vsel %vm2282_vm4, %v2285_v31, %v2287_v50  ;;  %v1997_v55 = vsub.s32 4, %v4059_v53 }
 0x12d   :  { %v4128_v0 = vmul.u32.u64.low %v4093_v25, %v2296_v46  ;;  %v4129_v9 = vmul.u32.u64.high %v4093_v25, %v2296_v46, %v4128_v0  ;;  %v2363_v1 = vadd.s32 1, %v2782_v6  ;;  %v1985_v61 = vshrl.u32 %v1967_v28, %v1983_v19 }
 0x12e   :  { %v1988_v4 = vadd.s32 127, %v1987_v16  ;;  %vm2122_vm11 = vcmp.lt.s32.totalorder %v4083_v24, 2  ;;  %vm2123_vm12 = vcmp.eq.s32.totalorder %v4083_v24, 0  ;;  %vm2126_vm13 = vcmp.eq.s32.totalorder %v4083_v24, 2 }
 0x12f   :  { %v2304_v40 = vmul.u32 %v4093_v25, %v2288_v11  ;;  %v2307_v3 = vadd.s32 1, %v4113_v37  ;;  %vm2364_vm14 = vcmp.gt.s32.totalorder %v2363_v1, 0  ;;  %v1986_v51 = vor.u32 %v1985_v61, %v1984_v15 }
 0x130   :  { %v2884_v35 = vpop.eup %2883  ;;  %v1989_v5 = vshll.u32 %v1988_v4, 23  ;;  %v2365_v8 = vsel %vm2364_vm14, %v2363_v1, 0  ;;  %v1998_v18 = vsel %vm1913_vm6, %v1997_v55, %v4059_v53  ;;  %vm2306_vm0 = vc.u32 %v4129_v9, %v4112_v59 }
 0x131   :  { %v2886_v47 = vpop.eup %2885  ;;  %v1907_v44 = vxor.u32 2147483648, %v2884_v35  ;;  %v2360_v62 = vand.u32 8388607, %v2353_v2  ;;  %v1993_v63 = vcvt.s32.f32 %v1986_v51  ;;  %v2308_v12 = vsel %vm2306_vm0, %v2307_v3, %v4113_v37 }
 0x132   :  { %v1904_v60 = vxor.u32 2147483648, %v2886_v47  ;;  %v1990_v52 = vor.u32 4788187, %v1989_v5  ;;  %v2367_v54 = vand.u32 31, %v2365_v8  ;;  %v2309_v17 = vadd.s32 %v2308_v12, %v2304_v40 }
 0x133   :  { %v1908_v29 = vsel %vm1906_vm9, %v1907_v44, %v2886_v47  ;;  %v2128_v49 = vsel %vm2126_vm13, %v1907_v44, %v2886_v47  ;;  %v2000_v41 = vsel %vm4120_vm10, 0, %v1998_v18  ;;  %v2366_v19 = vshrl.u32 %v2365_v8, 5 }
 0x134   :  { %v1905_v33 = vsel %vm1903_vm3, %v2884_v35, %v1904_v60  ;;  %v2125_v53 = vsel %vm2123_vm12, %v2884_v35, %v1904_v60  ;;  %v1991_v28 = vand.u32 2147483647, %v1990_v52  ;;  %v2368_v56 = vsub.s32 32, %v2367_v54 }
 0x135   :  { %v1909_v25 = vsel %vm1902_vm7, %v1905_v33, %v1908_v29  ;;  %v2129_v26 = vsel %vm2122_vm11, %v2125_v53, %v2128_v49  ;;  %v2310_v58 = vadd.s32 536870912, %v2309_v17  ;;  %v2370_v24 = vshll.u32 %v2914_v30, %v2367_v54 }
 0x136   :  { %v1910_v10 = vsel %vm1899_vm5, nan, %v1909_v25  ;;  %v2130_v31 = vsel %vm1899_vm5, nan, %v2129_v26  ;;  %v1994_v50 = vmul.f32 %v1993_v63, %v1991_v28  ;;  %v2371_v48 = vshrl.u32 %v2915_v32, %v2368_v56 }
 0x137   :  { %v2016_v42 = vmul.f32 %v4057_v22, %v1910_v10  ;;  %v2234_v43 = vmul.f32 %v2130_v31, %v4057_v22  ;;  %v2373_v27 = vshll.u32 %v2915_v32, %v2367_v54  ;;  %v2374_v57 = vshrl.u32 %v2916_v34, %v2368_v56 }
 0x138   :  { %v1995_v20 = vxor.u32 2147483648, %v1994_v50  ;;  %v4174_v46 = vshrl.u32 %v2310_v58, 30  ;;  %v2004_v6 = vadd.s32 3, %v2000_v41  ;;  %v2376_v15 = vshll.u32 %v2916_v34, %v2367_v54 }
 0x139   :  { %v2020_v37 = vcombine.low %v2016_v42, %v2016_v42  ;;  %2025 = vst [vmem:[%s4297_s2 + $0x88] sm:$0xf0] %v2016_v42  ;;  %2242 = vst [vmem:[%s4297_s2 + $0xa0] sm:$0xf] %v2234_v43  ;;  %v2238_v21 = vcombine.high %v2234_v43, %v2234_v43  ;;  %v2377_v32 = vshrl.u32 %v2917_v36, %v2368_v56  ;;  %v2361_v55 = vor.u32 8388608, %v2360_v62 }
 0x13a   :  { %v1996_v16 = vsel %vm1913_vm6, %v1995_v20, %v1994_v50  ;;  %v2312_v11 = vshll.u32 %v4174_v46, 30  ;;  %v2379_v0 = vshll.u32 %v2917_v36, %v2367_v54  ;;  %v2372_v1 = vor.u32 %v2371_v48, %v2370_v24 }
 0x13b   :  { %2024 = vst [vmem:[%s4297_s2 + $0x80] sm:$0xf0] %v2020_v37  ;;  %2243 = vst [vmem:[%s4297_s2 + $0xa8] sm:$0xf] %v2238_v21  ;;  %v1999_v34 = vsel %vm4120_vm10, %v3801_v23, %v1996_v16  ;;  %v2380_v61 = vshrl.u32 %v2918_v38, %v2368_v56  ;;  %v2382_v4 = vshll.u32 %v2918_v38, %v2367_v54  ;;  %vm2385_vm2 = vcmp.lt.s32.totalorder %v2366_v19, 1 }
 0x13c   :  { %2887 = vcosq.f32 %v1999_v34  ;;  %v4193_v35 = vsub.s32 %v2309_v17, %v2312_v11  ;;  %v2375_v40 = vor.u32 %v2374_v57, %v2373_v27  ;;  %v2383_v3 = vshrl.u32 %v2919_v45, %v2368_v56 }
 0x13d   :  { %2889 = vsinq.f32 %v1999_v34  ;;  %v2378_v47 = vor.u32 %v2377_v32, %v2376_v15  ;;  %v2381_v44 = vor.u32 %v2380_v61, %v2379_v0  ;;  %v2224_v36 = vand.u32 3, %v2000_v41 }
 0x13e   :  { %v2315_v51 = vsub.s32 0, %v4193_v35  ;;  %v2384_v7 = vor.u32 %v2383_v3, %v2382_v4  ;;  %v4197_v5 = vshll.u32 %v2361_v55, 8  ;;  %v2369_v8 = vshrl.u32 %v2914_v30, %v2368_v56 }
 0x13f   :  { %vm2386_vm1 = vcmp.lt.s32.totalorder %v2366_v19, 2  ;;  %vm2387_vm15 = vcmp.lt.s32.totalorder %v2366_v19, 3  ;;  %vm2388_vm4 = vcmp.lt.s32.totalorder %v2366_v19, 4  ;;  %v2393_v45 = vsel %vm2385_vm2, %v2372_v1, %v2375_v40 }
 0x140   :  { %v2779_v38 = vmin.u32 %v2315_v51, %v4193_v35  ;;  %v2390_v60 = vsel %vm2388_vm4, %v2378_v47, 2102212464  ;;  %v2394_v18 = vsel %vm2388_vm4, %v2381_v44, 920167782  ;;  %v2397_v29 = vsel %vm2385_vm2, %v2375_v40, %v2378_v47 }
 0x141   :  { %v2395_v62 = vsel %vm2387_vm15, %v2378_v47, %v2394_v18  ;;  %v2398_v52 = vsel %vm2388_vm4, %v2384_v7, 1326507024  ;;  %vm2003_vm3 = vweird.f32 %v3801_v23  ;;  %v2005_v63 = vand.u32 3, %v2004_v6 }
 0x142   :  { %vm2225_vm6 = vcmp.lt.s32.totalorder %v2224_v36, 2  ;;  %v2317_v49 = vclz %v2779_v38  ;;  %v2389_v30 = vsel %vm2385_vm2, %v2369_v8, %v2372_v1  ;;  %v2391_v33 = vsel %vm2387_vm15, %v2375_v40, %v2390_v60 }
 0x143   :  { %v2396_v53 = vsel %vm2386_vm1, %v2393_v45, %v2395_v62  ;;  %v2399_v12 = vsel %vm2387_vm15, %v2381_v44, %v2398_v52  ;;  %vm2226_vm7 = vcmp.eq.s32.totalorder %v2224_v36, 0  ;;  %vm2229_vm5 = vcmp.eq.s32.totalorder %v2224_v36, 2 }
 0x144   :  { %v2780_v54 = vadd.s32 4294967294, %v2317_v49  ;;  %v2400_v25 = vsel %vm2386_vm1, %v2397_v29, %v2399_v12  ;;  %v4211_v28 = vmul.u32.u64.low %v4197_v5, %v2396_v53  ;;  %v4212_v26 = vmul.u32.u64.high %v4197_v5, %v2396_v53, %v4211_v28 }
 0x145   :  { %v4216_v17 = vmul.u32.u64.low %v4197_v5, %v2400_v25  ;;  %v4217_v10 = vmul.u32.u64.high %v4197_v5, %v2400_v25, %v4216_v17  ;;  %vm2010_vm8 = vcmp.eq.s32.totalorder %v2005_v63, 2  ;;  %v2305_v31 = vadd.s32 %v4112_v59, %v4129_v9 }
 0x146   :  { %v2888_v41 = vpop.eup %2887  ;;  %vm2781_vm9 = vcmp.lt.s32.totalorder %v2780_v54, 0  ;;  %v2392_v56 = vsel %vm2386_vm1, %v2389_v30, %v2391_v33  ;;  %vm2006_vm10 = vcmp.lt.s32.totalorder %v2005_v63, 2  ;;  %vm2007_vm11 = vcmp.eq.s32.totalorder %v2005_v63, 0 }
 0x147   :  { %v2890_v42 = vpop.eup %2889  ;;  %v2011_v50 = vxor.u32 2147483648, %v2888_v41  ;;  %v2320_v43 = vsel %vm2781_vm9, 0, %v2780_v54  ;;  %v2408_v20 = vmul.u32 %v4197_v5, %v2392_v56  ;;  %vm2410_vm12 = vc.u32 %v4217_v10, %v4211_v28 }
 0x148   :  { %v2008_v58 = vxor.u32 2147483648, %v2890_v42  ;;  %v2321_v24 = vsub.s32 32, %v2320_v43  ;;  %v2322_v48 = vshll.u32 %v4193_v35, %v2320_v43  ;;  %v2325_v27 = vsub.s32 4294967266, %v2320_v43 }
 0x149   :  { %v2012_v57 = vsel %vm2010_vm8, %v2011_v50, %v2890_v42  ;;  %v2231_v37 = vsel %vm2229_vm5, %v2011_v50, %v2890_v42  ;;  %v2411_v32 = vadd.s32 1, %v4212_v26  ;;  %v2335_v47 = vsub.s32 4, %v4174_v46 }
 0x14a   :  { %v2009_v59 = vsel %vm2007_vm11, %v2888_v41, %v2008_v58  ;;  %v2228_v9 = vsel %vm2226_vm7, %v2888_v41, %v2008_v58  ;;  %v2323_v21 = vshrl.u32 %v2305_v31, %v2321_v24  ;;  %v2326_v6 = vadd.s32 127, %v2325_v27 }
 0x14b   :  { %v2013_v19 = vsel %vm2006_vm10, %v2009_v59, %v2012_v57  ;;  %v2232_v15 = vsel %vm2225_vm6, %v2228_v9, %v2231_v37  ;;  %v2412_v61 = vsel %vm2410_vm12, %v2411_v32, %v4212_v26  ;;  %vm2251_vm13 = vcmp.lt.s32.totalorder %v3937_v13, 0 }
 0x14c   :  { %v2014_v16 = vsel %vm2003_vm3, nan, %v2013_v19  ;;  %v2233_v11 = vsel %vm2003_vm3, nan, %v2232_v15  ;;  %v2324_v55 = vor.u32 %v2323_v21, %v2322_v48  ;;  %v2327_v0 = vshll.u32 %v2326_v6, 23 }
 0x14d   :  { %v2017_v34 = vmul.f32 %v4057_v22, %v2014_v16  ;;  %v2235_v1 = vmul.f32 %v2233_v11, %v4057_v22  ;;  %v2413_v40 = vadd.s32 %v2412_v61, %v2408_v20  ;;  %v2336_v7 = vsel %vm2251_vm13, %v2335_v47, %v4174_v46 }
 0x14e   :  { %v2328_v4 = vor.u32 4788187, %v2327_v0  ;;  %v2331_v35 = vcvt.s32.f32 %v2324_v55  ;;  %vm2250_vm14 = vcmp.le.f32.partialorder %v2249_v39, 0.7853982  ;;  %v2409_v39 = vadd.s32 %v4211_v28, %v4217_v10 }
 0x14f   :  { %v2021_v3 = vcombine.low %v2017_v34, %v2017_v34  ;;  %2027 = vst [vmem:[%s4297_s2 + $0x98] sm:$0xf0] %v2017_v34  ;;  %2244 = vst [vmem:[%s4297_s2 + $0xb0] sm:$0xf] %v2235_v1  ;;  %v2239_v23 = vcombine.high %v2235_v1, %v2235_v1  ;;  %v2414_v36 = vadd.s32 536870912, %v2413_v40  ;;  %v2338_v60 = vsel %vm2250_vm14, 0, %v2336_v7 }
 0x150   :  { %v2329_v44 = vand.u32 2147483647, %v2328_v4  ;;  %v2342_v29 = vadd.s32 3, %v2338_v60  ;;  %v2563_v30 = vand.u32 3, %v2338_v60  ;;  %vm2341_vm7 = vweird.f32 %v3937_v13 }
 0x151   :  { %2026 = vst [vmem:[%s4297_s2 + $0x90] sm:$0xf0] %v2021_v3  ;;  %2245 = vst [vmem:[%s4297_s2 + $0xb8] sm:$0xf] %v2239_v23  ;;  %v4252_v51 = vshrl.u32 %v2414_v36, 30  ;;  %v2457_v10 = vstv %s2777_s20  ;;  %vm2355_vm5 = vcmp.lt.s32.totalorder %v4064_v14, 0 }
 0x152   :  { %v2332_v22 = vmul.f32 %v2331_v35, %v2329_v44  ;;  %v2343_v49 = vand.u32 3, %v2342_v29  ;;  %vm2568_vm1 = vcmp.eq.s32.totalorder %v2563_v30, 2  ;;  %vm2565_vm3 = vcmp.eq.s32.totalorder %v2563_v30, 0 }
 0x153   :  { %v2416_v8 = vshll.u32 %v4252_v51, 30  ;;  %vm2564_vm6 = vcmp.lt.s32.totalorder %v2563_v30, 2  ;;  %vm2354_vm8 = vcmp.le.f32.partialorder %v2353_v2, 0.7853982 }
 0x154   :  { %v2333_v5 = vxor.u32 2147483648, %v2332_v22  ;;  %vm2348_vm2 = vcmp.eq.s32.totalorder %v2343_v49, 2  ;;  %vm2344_vm15 = vcmp.lt.s32.totalorder %v2343_v49, 2  ;;  %vm2345_vm4 = vcmp.eq.s32.totalorder %v2343_v49, 0 }
 0x155   :  { %v2417_v45 = vsub.s32 %v2413_v40, %v2416_v8 }
 0x156   :  { %v2334_v38 = vsel %vm2251_vm13, %v2333_v5, %v2332_v22 }
 0x157   :  { %v2337_v18 = vsel %vm2250_vm14, %v3937_v13, %v2334_v38  ;;  %v2419_v62 = vsub.s32 0, %v2417_v45  ;;  %v2439_v13 = vsub.s32 4, %v4252_v51 }
 0x158   :  { %2891 = vcosq.f32 %v2337_v18 }
 0x159   :  { %2893 = vsinq.f32 %v2337_v18  ;;  %v2783_v52 = vmin.u32 %v2419_v62, %v2417_v45  ;;  %v2440_v11 = vsel %vm2355_vm5, %v2439_v13, %v4252_v51 }
 0x15a   :  { %v2442_v34 = vsel %vm2354_vm8, 0, %v2440_v11 }
 0x15b   :  { %v2421_v63 = vclz %v2783_v52  ;;  %v2446_v1 = vadd.s32 3, %v2442_v34  ;;  %v2666_v4 = vand.u32 3, %v2442_v34 }
 0x15d   :  { %v2784_v46 = vadd.s32 4294967294, %v2421_v63  ;;  %v2447_v61 = vand.u32 3, %v2446_v1  ;;  %vm2671_vm10 = vcmp.eq.s32.totalorder %v2666_v4, 2  ;;  %vm2668_vm12 = vcmp.eq.s32.totalorder %v2666_v4, 0 }
 0x15e   :  { %vm2667_vm14 = vcmp.lt.s32.totalorder %v2666_v4, 2 }
 0x15f   :  { %vm2785_vm0 = vcmp.lt.s32.totalorder %v2784_v46, 0  ;;  %vm2452_vm9 = vcmp.eq.s32.totalorder %v2447_v61, 2  ;;  %vm2449_vm11 = vcmp.eq.s32.totalorder %v2447_v61, 0  ;;  %vm2448_vm13 = vcmp.lt.s32.totalorder %v2447_v61, 2 }
 0x160   :  { %v2424_v33 = vsel %vm2785_vm0, 0, %v2784_v46  ;;  %vm2445_vm0 = vweird.f32 %v4064_v14 }
 0x161   :  { %v2425_v12 = vsub.s32 32, %v2424_v33  ;;  %v2426_v54 = vshll.u32 %v2417_v45, %v2424_v33  ;;  %v2429_v25 = vsub.s32 4294967266, %v2424_v33 }
 0x162   :  { %v2892_v53 = vpop.eup %2891 }
 0x163   :  { %v2894_v26 = vpop.eup %2893  ;;  %v2349_v17 = vxor.u32 2147483648, %v2892_v53  ;;  %v2427_v31 = vshrl.u32 %v2409_v39, %v2425_v12  ;;  %v2430_v56 = vadd.s32 127, %v2429_v25 }
 0x164   :  { %v2346_v41 = vxor.u32 2147483648, %v2894_v26 }
 0x165   :  { %v2350_v28 = vsel %vm2348_vm2, %v2349_v17, %v2894_v26  ;;  %v2570_v42 = vsel %vm2568_vm1, %v2349_v17, %v2894_v26  ;;  %v2428_v43 = vor.u32 %v2427_v31, %v2426_v54  ;;  %v2431_v58 = vshll.u32 %v2430_v56, 23 }
 0x166   :  { %v2347_v50 = vsel %vm2345_vm4, %v2892_v53, %v2346_v41  ;;  %v2567_v24 = vsel %vm2565_vm3, %v2892_v53, %v2346_v41 }
 0x167   :  { %v2351_v48 = vsel %vm2344_vm15, %v2347_v50, %v2350_v28  ;;  %v2571_v27 = vsel %vm2564_vm6, %v2567_v24, %v2570_v42  ;;  %v2432_v37 = vor.u32 4788187, %v2431_v58  ;;  %v2435_v20 = vcvt.s32.f32 %v2428_v43 }
 0x168   :  { %v2352_v57 = vsel %vm2341_vm7, nan, %v2351_v48  ;;  %v2572_v59 = vsel %vm2341_vm7, nan, %v2571_v27 }
 0x169   :  { %v2458_v9 = vmul.f32 %v2457_v10, %v2352_v57  ;;  %v2676_v21 = vmul.f32 %v2572_v59, %v2457_v10  ;;  %v2433_v6 = vand.u32 2147483647, %v2432_v37 }
 0x16b   :  { %v2462_v19 = vcombine.low %v2458_v9, %v2458_v9  ;;  %2467 = vst [vmem:[%s4297_s2 + $0xa8] sm:$0xf0] %v2458_v9  ;;  %2684 = vst [vmem:[%s4297_s2 + $0xc0] sm:$0xf] %v2676_v21  ;;  %v2680_v15 = vcombine.high %v2676_v21, %v2676_v21  ;;  %v2436_v32 = vmul.f32 %v2435_v20, %v2433_v6 }
 0x16d   :  { %2466 = vst [vmem:[%s4297_s2 + $0xa0] sm:$0xf0] %v2462_v19  ;;  %2685 = vst [vmem:[%s4297_s2 + $0xc8] sm:$0xf] %v2680_v15  ;;  %v2437_v16 = vxor.u32 2147483648, %v2436_v32 }
 0x16f   :  { %v2438_v55 = vsel %vm2355_vm5, %v2437_v16, %v2436_v32 }
 0x170   :  { %v2441_v0 = vsel %vm2354_vm8, %v4064_v14, %v2438_v55 }
 0x171   :  { %2895 = vcosq.f32 %v2441_v0 }
 0x172   :  { %2897 = vsinq.f32 %v2441_v0 }
 0x17b   :  { %v2896_v35 = vpop.eup %2895 }
 0x17c   :  { %v2898_v40 = vpop.eup %2897  ;;  %v2453_v3 = vxor.u32 2147483648, %v2896_v35 }
 0x17d   :  { %v2450_v2 = vxor.u32 2147483648, %v2898_v40 }
 0x17e   :  { %v2454_v23 = vsel %vm2452_vm9, %v2453_v3, %v2898_v40  ;;  %v2673_v47 = vsel %vm2671_vm10, %v2453_v3, %v2898_v40 }
 0x17f   :  { %v2451_v44 = vsel %vm2449_vm11, %v2896_v35, %v2450_v2  ;;  %v2670_v36 = vsel %vm2668_vm12, %v2896_v35, %v2450_v2 }
 0x180   :  { %v2455_v22 = vsel %vm2448_vm13, %v2451_v44, %v2454_v23  ;;  %v2674_v51 = vsel %vm2667_vm14, %v2670_v36, %v2673_v47 }
 0x181   :  { %v2456_v7 = vsel %vm2445_vm0, nan, %v2455_v22  ;;  %v2675_v5 = vsel %vm2445_vm0, nan, %v2674_v51 }
 0x182   :  { %v2459_v8 = vmul.f32 %v2457_v10, %v2456_v7  ;;  %v2677_v38 = vmul.f32 %v2675_v5, %v2457_v10 }
 0x184   :  { %v2463_v60 = vcombine.low %v2459_v8, %v2459_v8  ;;  %2469 = vst [vmem:[%s4297_s2 + $0xb8] sm:$0xf0] %v2459_v8  ;;  %2686 = vst [vmem:[%s4297_s2 + $0xd0] sm:$0xf] %v2677_v38  ;;  %v2681_v14 = vcombine.high %v2677_v38, %v2677_v38 }
 0x186   :  { %2468 = vst [vmem:[%s4297_s2 + $0xb0] sm:$0xf0] %v2463_v60  ;;  %2687 = vst [vmem:[%s4297_s2 + $0xd8] sm:$0xf] %v2681_v14 }
 0x187   :  { %2692 = vsyncpa [#allocation3], 1 }

</bundles_post_ra>
